<compile_context>
chip_gen: v7x
topology: tpu7x:2x2x1
jax: 0.10.0
libtpu: 0.0.40
codegen_flags: <defaults>
</compile_context>

<pallas_src>
import jax
import jax.numpy as jnp
import numpy as np
from jax import lax
from jax.experimental import pallas as pl
from jax.experimental.pallas import tpu as pltpu


# ---------------------------------------------------------------------------
# small helpers
# ---------------------------------------------------------------------------
def _pad_axis(x, axis, mult):
    size = x.shape[axis]
    rem = (-size) % mult
    if rem == 0:
        return x
    pad = [(0, 0)] * x.ndim
    pad[axis] = (0, rem)
    return jnp.pad(x, pad)


def _pick_tile(dim, pref, mult):
    """Largest divisor of `dim` that is <= pref and a multiple of `mult`.
    `dim` must already be a multiple of `mult` (pad first)."""
    pref = min(pref, dim)
    d = (pref // mult) * mult
    while d >= mult:
        if dim % d == 0:
            return d
        d -= mult
    return dim


def _largest_divisor_leq(n, cap):
    cap = max(1, min(cap, n))
    for d in range(cap, 0, -1):
        if n % d == 0:
            return d
    return 1


def _default_matmul_tm():
    # v5e's MXU is 4x(128x128): 128 rows already fill it; wins there come from
    # bf16 bytes, not bigger M tiles.  v6e/v7x (256x256 MXU, higher HBM BW)
    # want 256-512 row tiles to approach the HBM roofline.
    try:
        kind = jax.devices()[0].device_kind.lower()
        if "v5 lite" in kind or "v5e" in kind or "v5litepod" in kind:
            return 128
    except Exception:
        pass
    return 512


# ---------------------------------------------------------------------------
# Generic tiled matmul + bias:  out = a @ b + bias   (f32 accumulation)
# Used for the input->gates projection and the (unfused) decoder.
# ---------------------------------------------------------------------------
def _matmul_bias_kernel(a_ref, b_ref, bias_ref, o_ref, acc_ref):
    k = pl.program_id(2)

    @pl.when(k == 0)
    def _():
        acc_ref[...] = jnp.zeros_like(acc_ref)

    acc_ref[...] += jnp.dot(a_ref[...], b_ref[...],
                            preferred_element_type=jnp.float32)

    @pl.when(k == pl.num_programs(2) - 1)
    def _():
        o_ref[...] = (acc_ref[...] + bias_ref[...]).astype(o_ref.dtype)


def matmul_bias(a, b, bias, *, out_dtype=jnp.float32, tm=None, tn=512, tk=512):
    """a: (M, K), b: (K, N), bias: (1, N) -> (M, N) in out_dtype.

    Inputs are zero-padded to (8,128)-aligned shapes so block tiles are always
    clean divisors (no full-extent fallback blocks / VMEM blowups for e.g.
    non-128-multiple vocab sizes)."""
    M, K = a.shape
    K2, N = b.shape
    assert K == K2 and bias.shape == (1, N)
    if tm is None:
        tm = _default_matmul_tm()

    a = _pad_axis(_pad_axis(a, 0, 8), 1, 128)
    b = _pad_axis(_pad_axis(b, 0, 128), 1, 128)
    bias = _pad_axis(bias, 1, 128)
    Mp, Kp = a.shape
    Np = b.shape[1]

    tm = _pick_tile(Mp, tm, 8)
    tn = _pick_tile(Np, tn, 128)
    tk = _pick_tile(Kp, tk, 128)
    grid = (Mp // tm, Np // tn, Kp // tk)

    out = pl.pallas_call(
        _matmul_bias_kernel,
        out_shape=jax.ShapeDtypeStruct((Mp, Np), out_dtype),
        grid_spec=pltpu.PrefetchScalarGridSpec(
            num_scalar_prefetch=0,
            grid=grid,
            in_specs=[
                pl.BlockSpec((tm, tk), lambda i, j, k: (i, k)),
                pl.BlockSpec((tk, tn), lambda i, j, k: (k, j)),
                pl.BlockSpec((1, tn), lambda i, j, k: (0, j)),
            ],
            out_specs=pl.BlockSpec((tm, tn), lambda i, j, k: (i, j)),
            scratch_shapes=[pltpu.VMEM((tm, tn), jnp.float32)],
        ),
        compiler_params=pltpu.CompilerParams(
            dimension_semantics=("parallel", "parallel", "arbitrary")),
    )(a, b, bias)

    if (Mp, Np) != (M, N):
        out = out[:M, :N]
    return out


# ---------------------------------------------------------------------------
# GRU recurrence (+ optionally fused decoder)
# ---------------------------------------------------------------------------
def _gru_step(gi, h, w_hh_ref, b_hhn_b, hdim):
    """One GRU step, PyTorch gate order [r, z, n].

    gi = x@W_ih + b_ih + [b_hh_r, b_hh_z, 0]   (r/z hidden-bias folded in)
    n  = tanh(gi_n + r * (h@W_hn + b_hh_n))    (b_hh_n scaled by r, as in nn.GRU)
    """
    # TODO(synk): keep w_hh resident in the MXU across the unrolled time loop
    # via pltpu.matmul_push_rhs / matmul_acc_lhs / matmul_pop (same RHS every
    # step); kept as jnp.dot for portability across chip generations.
    gh = jnp.dot(h.astype(w_hh_ref.dtype), w_hh_ref[...],
                 preferred_element_type=jnp.float32)
    r = jax.nn.sigmoid(gi[:, 0:hdim] + gh[:, 0:hdim])
    z = jax.nn.sigmoid(gi[:, hdim:2 * hdim] + gh[:, hdim:2 * hdim])
    n = jnp.tanh(gi[:, 2 * hdim:] + r * (gh[:, 2 * hdim:] + b_hhn_b))
    return (1.0 - z) * n + z * h


def _make_gru_kernel(fuse_decoder):
    if fuse_decoder:
        def kernel(gi_ref, h0_ref, w_hh_ref, b_hhn_ref, w_dec_ref, b_dec_ref,
                   dec_ref, hfin_ref, h_scratch, hblk_scratch):
            t = pl.program_id(1)

            @pl.when(t == 0)
            def _():
                h_scratch[...] = h0_ref[...].astype(jnp.float32)

            t_blk, bb, hdim = hblk_scratch.shape
            # hoist the (1,H)->(B,H) bias broadcast out of the unrolled loop
            b_hhn_b = jnp.broadcast_to(b_hhn_ref[...], (bb, hdim))

            def step(i, h):
                gi = gi_ref[i].astype(jnp.float32)
                h_new = _gru_step(gi, h, w_hh_ref, b_hhn_b, hdim)
                hblk_scratch[i] = h_new.astype(hblk_scratch.dtype)
                return h_new

            h_scratch[...] = lax.fori_loop(0, t_blk, step, h_scratch[...],
                                           unroll=True)
            hfin_ref[...] = h_scratch[...]

            # Fused decoder for this time block: one (t_blk*B, H) x (H, Vp)
            # matmul riding on the recurrence's MXU/DMA slack.  w_dec's block
            # index never changes, so it stays resident in VMEM.
            vdim = dec_ref.shape[-1]
            hb = hblk_scratch[...].reshape(t_blk * bb, hdim)
            dec = jnp.dot(hb, w_dec_ref[...],
                          preferred_element_type=jnp.float32) + b_dec_ref[...]
            dec_ref[...] = dec.reshape(t_blk, bb, vdim).astype(dec_ref.dtype)

        return kernel

    def kernel(gi_ref, h0_ref, w_hh_ref, b_hhn_ref, hs_ref, hfin_ref, h_scratch):
        t = pl.program_id(1)

        @pl.when(t == 0)
        def _():
            h_scratch[...] = h0_ref[...].astype(jnp.float32)

        t_blk, bb, hdim = hs_ref.shape
        b_hhn_b = jnp.broadcast_to(b_hhn_ref[...], (bb, hdim))

        def step(i, h):
            gi = gi_ref[i].astype(jnp.float32)
            h_new = _gru_step(gi, h, w_hh_ref, b_hhn_b, hdim)
            hs_ref[i] = h_new.astype(hs_ref.dtype)   # emitted in compute dtype
            return h_new

        h_scratch[...] = lax.fori_loop(0, t_blk, step, h_scratch[...],
                                       unroll=True)
        hfin_ref[...] = h_scratch[...]

    return kernel


# ---------------------------------------------------------------------------
# Parameter preparation (one-time): dtype casts, bias folding, vocab padding.
# ---------------------------------------------------------------------------
def prepare_gca_params(w_ih, w_hh, b_ih, b_hh, w_dec, b_dec,
                       *, compute_dtype=jnp.float32):
    """w_ih: (E,3H), w_hh: (H,3H), b_*: (1,3H), w_dec: (H,V), b_dec: (1,V)."""
    H = w_hh.shape[0]
    assert w_hh.shape == (H, 3 * H)
    assert H % 128 == 0, "hidim must be a multiple of 128 for this Pallas path"
    cd = compute_dtype

    b_ih_f = jnp.asarray(b_ih, jnp.float32).reshape(1, 3 * H)
    b_hh_f = jnp.asarray(b_hh, jnp.float32).reshape(1, 3 * H)
    # fold the r/z slices of b_hh into b_ih (the n slice cannot fold: r-scaled)
    b_ih_folded = b_ih_f.at[:, :2 * H].add(b_hh_f[:, :2 * H])
    b_hhn = b_hh_f[:, 2 * H:]

    V = w_dec.shape[1]
    w_dec_p = _pad_axis(jnp.asarray(w_dec), 1, 128)          # lane-dense vocab
    b_dec_p = _pad_axis(jnp.asarray(b_dec, jnp.float32).reshape(1, -1), 1, 128)

    return dict(
        w_ih=jnp.asarray(w_ih).astype(cd),
        b_ih=b_ih_folded,                 # biases stay f32 (added to f32 acc)
        w_hh=jnp.asarray(w_hh).astype(cd),
        b_hhn=b_hhn,
        w_dec=w_dec_p.astype(cd),
        b_dec=b_dec_p,
        vocab_size=V,
        hidim=H,
        compute_dtype=cd,
    )


# ---------------------------------------------------------------------------
# Full forward (embedding lookup is plain-JAX glue in the caller).
# ---------------------------------------------------------------------------
def gca_forward_pallas(seq_emb, h0, params, *, t_blk_cap=32, batch_split=1,
                       fuse_decoder=None):
    """seq_emb: (T, B, E) (ideally already in params['compute_dtype']),
    h0: (B, H) f32.  Returns (decoded (T*B, V) f32, hidden (1, B, H) f32)."""
    T, B, E = seq_emb.shape
    H = params['hidim']
    V = params['vocab_size']
    Vp = params['w_dec'].shape[1]
    cd = params['compute_dtype']
    assert h0.shape == (B, H)

    # pad batch to a sublane multiple (padded rows are dead work, sliced off)
    Bp = B + ((-B) % 8)
    if Bp != B:
        seq_emb = jnp.pad(seq_emb, ((0, 0), (0, Bp - B), (0, 0)))
        h0 = jnp.pad(h0, ((0, Bp - B), (0, 0)))

    # optional batch split across TensorCores (v7x has 2); keep shards aligned
    nb = batch_split if (batch_split >= 1 and Bp % (8 * max(batch_split, 1)) == 0) else 1
    Bb = Bp // nb

    # time block: largest divisor of T <= cap (never fully unrolls long T)
    t_blk = _largest_divisor_leq(T, t_blk_cap)

    # 1) input->gates projection for ALL timesteps (parallel, MXU-friendly M),
    #    emitted directly in compute dtype (bf16 halves its HBM roundtrip).
    gi_all = matmul_bias(seq_emb.reshape(T * Bp, E), params['w_ih'],
                         params['b_ih'], out_dtype=cd)
    gi_all = gi_all.reshape(T, Bp, 3 * H)

    # Fuse the decoder into the recurrence if w_dec + decoded blocks fit
    # comfortably in VMEM (v7x scoped default is 32 MiB); otherwise fall back
    # to a separate tiled matmul over the 128-padded vocab.
    if fuse_decoder is None:
        w_dec_bytes = 2 * H * Vp * np.dtype(cd).itemsize
        dec_blk_bytes = 2 * t_blk * Bb * Vp * 4
        fuse_decoder = (w_dec_bytes + dec_blk_bytes) <= (12 << 20)

    grid = (nb, T // t_blk)
    cparams = pltpu.CompilerParams(
        dimension_semantics=("parallel", "arbitrary"))  # time is a true recurrence

    if fuse_decoder:
        dec, hfin = pl.pallas_call(
            _make_gru_kernel(True),
            out_shape=[jax.ShapeDtypeStruct((T, Bp, Vp), jnp.float32),
                       jax.ShapeDtypeStruct((Bp, H), jnp.float32)],
            grid_spec=pltpu.PrefetchScalarGridSpec(
                num_scalar_prefetch=0,
                grid=grid,
                in_specs=[
                    pl.BlockSpec((t_blk, Bb, 3 * H), lambda b, t: (t, b, 0)),
                    pl.BlockSpec((Bb, H), lambda b, t: (b, 0)),
                    pl.BlockSpec((H, 3 * H), lambda b, t: (0, 0)),
                    pl.BlockSpec((1, H), lambda b, t: (0, 0)),
                    pl.BlockSpec((H, Vp), lambda b, t: (0, 0)),
                    pl.BlockSpec((1, Vp), lambda b, t: (0, 0)),
                ],
                out_specs=[
                    pl.BlockSpec((t_blk, Bb, Vp), lambda b, t: (t, b, 0)),
                    pl.BlockSpec((Bb, H), lambda b, t: (b, 0)),
                ],
                scratch_shapes=[pltpu.VMEM((Bb, H), jnp.float32),
                                pltpu.VMEM((t_blk, Bb, H), cd)],
            ),
            compiler_params=cparams,
        )(gi_all, h0, params['w_hh'], params['b_hhn'],
          params['w_dec'], params['b_dec'])
        decoded = dec[:, :B, :V].reshape(T * B, V)
    else:
        hs, hfin = pl.pallas_call(
            _make_gru_kernel(False),
            out_shape=[jax.ShapeDtypeStruct((T, Bp, H), cd),
                       jax.ShapeDtypeStruct((Bp, H), jnp.float32)],
            grid_spec=pltpu.PrefetchScalarGridSpec(
                num_scalar_prefetch=0,
                grid=grid,
                in_specs=[
                    pl.BlockSpec((t_blk, Bb, 3 * H), lambda b, t: (t, b, 0)),
                    pl.BlockSpec((Bb, H), lambda b, t: (b, 0)),
                    pl.BlockSpec((H, 3 * H), lambda b, t: (0, 0)),
                    pl.BlockSpec((1, H), lambda b, t: (0, 0)),
                ],
                out_specs=[
                    pl.BlockSpec((t_blk, Bb, H), lambda b, t: (t, b, 0)),
                    pl.BlockSpec((Bb, H), lambda b, t: (b, 0)),
                ],
                scratch_shapes=[pltpu.VMEM((Bb, H), jnp.float32)],
            ),
            compiler_params=cparams,
        )(gi_all, h0, params['w_hh'], params['b_hhn'])
        dec = matmul_bias(hs.reshape(T * Bp, H), params['w_dec'],
                          params['b_dec'], out_dtype=jnp.float32)
        decoded = dec.reshape(T, Bp, Vp)[:, :B, :V].reshape(T * B, V)

    hidden = hfin[:B][None, :, :]       # (nlayers=1, B, H)
    return decoded, hidden


# ---------------------------------------------------------------------------
# Pure-JAX reference (lax.scan GRU) for correctness checks
# ---------------------------------------------------------------------------
def gca_forward_ref(seq_emb, h0, w_ih, w_hh, b_ih, b_hh, w_dec, b_dec):
    H = h0.shape[-1]

    def cell(h, x):
        gi = x @ w_ih + b_ih
        gh = h @ w_hh + b_hh
        r = jax.nn.sigmoid(gi[:, :H] + gh[:, :H])
        z = jax.nn.sigmoid(gi[:, H:2 * H] + gh[:, H:2 * H])
        n = jnp.tanh(gi[:, 2 * H:] + r * gh[:, 2 * H:])
        h_new = (1.0 - z) * n + z * h
        return h_new, h_new

    h_fin, hs = lax.scan(cell, h0, seq_emb)
    T, B, _ = hs.shape
    decoded = hs.reshape(T * B, H) @ w_dec + b_dec
    return decoded, h_fin[None, :, :]


# ---------------------------------------------------------------------------
# Deterministic parameter init (mirrors GCA.init_weights, pretrain path)
# ---------------------------------------------------------------------------
def make_params(key, vocab_size, emdim, hidim):
    ks = jax.random.split(key, 6)

    # random_embedding: uniform(-scale, scale), scale = sqrt(3/emdim)
    scale = float(np.sqrt(3.0 / emdim))
    emb = jax.random.uniform(ks[0], (vocab_size, emdim),
                             minval=-scale, maxval=scale, dtype=jnp.float32)

    def xavier_normal(k, fan_out, fan_in):
        std = float(np.sqrt(2.0 / (fan_in + fan_out)))
        return std * jax.random.normal(k, (fan_out, fan_in), dtype=jnp.float32)

    # GRU params, stored transposed (in_dim, 3H) for the kernel's x @ W layout
    w_ih = xavier_normal(ks[1], 3 * hidim, emdim).T        # (E, 3H)
    w_hh = xavier_normal(ks[2], 3 * hidim, hidim).T        # (H, 3H)
    b_ih = jnp.zeros((1, 3 * hidim), jnp.float32)
    b_hh = jnp.zeros((1, 3 * hidim), jnp.float32)

    # decoder: xavier_normal weight, zero bias; stored transposed (H, V)
    w_dec = xavier_normal(ks[3], vocab_size, hidim).T      # (H, V)
    b_dec = jnp.zeros((1, vocab_size), jnp.float32)

    return emb, w_ih, w_hh, b_ih, b_hh, w_dec, b_dec


if __name__ == "__main__":
    # Pretrain LM path, rnn_type='GRU', nlayers=1, dropout=0.0.
    key = jax.random.PRNGKey(0)

    # ---- Config 1: aligned shapes, f32, fused decoder (auto) ---------------
    T, B, E, H, V = 24, 16, 128, 128, 384
    kp, kseq = jax.random.split(key)
    emb, w_ih, w_hh, b_ih, b_hh, w_dec, b_dec = make_params(kp, V, E, H)
    seq = jax.random.randint(kseq, (T, B), 0, V, dtype=jnp.int32)  # inputs['seq']
    h0 = jnp.zeros((B, H), jnp.float32)                            # init_hidden
    seq_emb = jnp.take(emb, seq, axis=0)                           # (T, B, E)

    params_f32 = prepare_gca_params(w_ih, w_hh, b_ih, b_hh, w_dec, b_dec)
    decoded, hidden = gca_forward_pallas(seq_emb, h0, params_f32)
    jax.block_until_ready(decoded)
    jax.block_until_ready(hidden)

    decoded_ref, hidden_ref = gca_forward_ref(
        seq_emb, h0, w_ih, w_hh, b_ih, b_hh, w_dec, b_dec)
    np.testing.assert_allclose(np.asarray(decoded), np.asarray(decoded_ref),
                               rtol=2e-3, atol=2e-3)
    np.testing.assert_allclose(np.asarray(hidden), np.asarray(hidden_ref),
                               rtol=2e-3, atol=2e-3)
    assert decoded.shape == (T * B, V)
    assert hidden.shape == (1, B, H)

    # ---- Config 1b: bf16 weights + bf16 activations/intermediates ----------
    params_bf16 = prepare_gca_params(w_ih, w_hh, b_ih, b_hh, w_dec, b_dec,
                                     compute_dtype=jnp.bfloat16)
    # bf16 embedding table -> seq_emb already bf16 (no extra wrapper cast pass)
    seq_emb_bf16 = jnp.take(emb.astype(jnp.bfloat16), seq, axis=0)
    decoded_bf, hidden_bf = gca_forward_pallas(seq_emb_bf16, h0, params_bf16)
    jax.block_until_ready(decoded_bf)
    np.testing.assert_allclose(np.asarray(decoded_bf), np.asarray(decoded_ref),
                               rtol=0.0, atol=0.1)
    np.testing.assert_allclose(np.asarray(hidden_bf), np.asarray(hidden_ref),
                               rtol=0.0, atol=0.1)

    # ---- Config 2: ragged shapes (batch/E/V padding paths), unfused decoder,
    #                batch split across cores, nonzero initial hidden ----------
    T2, B2, E2, H2, V2 = 10, 12, 96, 128, 200
    kp2, kseq2, kh2 = jax.random.split(jax.random.fold_in(key, 1), 3)
    emb2, w_ih2, w_hh2, b_ih2, b_hh2, w_dec2, b_dec2 = make_params(kp2, V2, E2, H2)
    seq2 = jax.random.randint(kseq2, (T2, B2), 0, V2, dtype=jnp.int32)
    h0_2 = 0.1 * jax.random.normal(kh2, (B2, H2), dtype=jnp.float32)
    seq_emb2 = jnp.take(emb2, seq2, axis=0)

    params2 = prepare_gca_params(w_ih2, w_hh2, b_ih2, b_hh2, w_dec2, b_dec2)
    decoded2, hidden2 = gca_forward_pallas(seq_emb2, h0_2, params2,
                                           fuse_decoder=False, batch_split=2)
    jax.block_until_ready(decoded2)
    decoded2_ref, hidden2_ref = gca_forward_ref(
        seq_emb2, h0_2, w_ih2, w_hh2, b_ih2, b_hh2, w_dec2, b_dec2)
    np.testing.assert_allclose(np.asarray(decoded2), np.asarray(decoded2_ref),
                               rtol=2e-3, atol=2e-3)
    np.testing.assert_allclose(np.asarray(hidden2), np.asarray(hidden2_ref),
                               rtol=2e-3, atol=2e-3)
    assert decoded2.shape == (T2 * B2, V2)
    assert hidden2.shape == (1, B2, H2)

    # TODO(synk): conditional branches (Gated / InputAttention / GCAInteraction /
    # CHGRU / init_hidden Linear) depend on external sub-modules not defined in
    # the reference file; only the pretrain-LM forward path is implemented.
    print("KERNEL_OK")
</pallas_src>

<mosaic_0001>
module attributes {stable_mosaic.version = 11 : i64} {
  func.func @_matmul_bias_kernel(%arg0: i32, %arg1: i32, %arg2: i32, %arg3: memref<384x128xf32, #tpu.memory_space<vmem>>, %arg4: memref<128x384xf32, #tpu.memory_space<vmem>>, %arg5: memref<1x384xf32, #tpu.memory_space<vmem>>, %arg6: memref<384x384xf32, #tpu.memory_space<vmem>>, %arg7: memref<384x384xf32, #tpu.memory_space<vmem>>) attributes {dimension_semantics = [#tpu.dimension_semantics<parallel>, #tpu.dimension_semantics<parallel>, #tpu.dimension_semantics<arbitrary>], iteration_bounds = array<i64: 1, 1, 1>, scalar_prefetch = 0 : i64, scratch_operands = 1 : i64, tpu.core_type = #tpu.core_type<tc>, window_params = [{transform_indices = @transform_0, window_bounds = array<i64: 384, 128>}, {transform_indices = @transform_1, window_bounds = array<i64: 128, 384>}, {transform_indices = @transform_2, window_bounds = array<i64: 1, 384>}, {transform_indices = @transform_3, window_bounds = array<i64: 384, 384>}]} {
    %c0_i32 = arith.constant 0 : i32
    %0 = arith.cmpi eq, %arg2, %c0_i32 : i32
    %1 = arith.extui %0 : i1 to i32
    %c0_i32_0 = arith.constant 0 : i32
    %2 = arith.cmpi ne, %1, %c0_i32_0 : i32
    scf.if %2 {
      %cst_10 = arith.constant 0.000000e+00 : f32
      %12 = vector.broadcast %cst_10 : f32 to vector<384x384xf32>
      %c0_11 = arith.constant 0 : index
      %c0_12 = arith.constant 0 : index
      %13 = vector.load %arg7[%c0_11, %c0_12] : memref<384x384xf32, #tpu.memory_space<vmem>>, vector<384x384xf32>
      tpu.vector_store %arg7[%c0_11, %c0_12], %12 {strides = array<i32>} : memref<384x384xf32, #tpu.memory_space<vmem>>, vector<384x384xf32>,
    } else {
    }
    %c0 = arith.constant 0 : index
    %c0_1 = arith.constant 0 : index
    %3 = vector.load %arg7[%c0, %c0_1] : memref<384x384xf32, #tpu.memory_space<vmem>>, vector<384x384xf32>
    %c0_2 = arith.constant 0 : index
    %c0_3 = arith.constant 0 : index
    %4 = vector.load %arg3[%c0_2, %c0_3] : memref<384x128xf32, #tpu.memory_space<vmem>>, vector<384x128xf32>
    %c0_4 = arith.constant 0 : index
    %c0_5 = arith.constant 0 : index
    %5 = vector.load %arg4[%c0_4, %c0_5] : memref<128x384xf32, #tpu.memory_space<vmem>>, vector<128x384xf32>
    %cst = arith.constant dense<0.000000e+00> : vector<384x384xf32>
    %6 = tpu.matmul %4, %5, %cst {dimension_numbers = #tpu.dot_dimension_numbers<[1], [0], [0], [1], [0, 0, 1, 1], [], []>} : vector<384x128xf32>, vector<128x384xf32>, vector<384x384xf32> -> vector<384x384xf32>
    %7 = arith.addf %3, %6 : vector<384x384xf32>
    %c0_6 = arith.constant 0 : index
    %c0_7 = arith.constant 0 : index
    %8 = vector.load %arg7[%c0_6, %c0_7] : memref<384x384xf32, #tpu.memory_space<vmem>>, vector<384x384xf32>
    tpu.vector_store %arg7[%c0_6, %c0_7], %7 {strides = array<i32>} : memref<384x384xf32, #tpu.memory_space<vmem>>, vector<384x384xf32>,
    %c0_i32_8 = arith.constant 0 : i32
    %9 = arith.cmpi eq, %arg2, %c0_i32_8 : i32
    %10 = arith.extui %9 : i1 to i32
    %c0_i32_9 = arith.constant 0 : i32
    %11 = arith.cmpi ne, %10, %c0_i32_9 : i32
    scf.if %11 {
      %c0_10 = arith.constant 0 : index
      %c0_11 = arith.constant 0 : index
      %12 = vector.load %arg7[%c0_10, %c0_11] : memref<384x384xf32, #tpu.memory_space<vmem>>, vector<384x384xf32>
      %c0_12 = arith.constant 0 : index
      %c0_13 = arith.constant 0 : index
      %13 = vector.load %arg5[%c0_12, %c0_13] : memref<1x384xf32, #tpu.memory_space<vmem>>, vector<1x384xf32>
      %14 = vector.broadcast %13 : vector<1x384xf32> to vector<384x384xf32>
      %15 = arith.addf %12, %14 : vector<384x384xf32>
      %c0_14 = arith.constant 0 : index
      %c0_15 = arith.constant 0 : index
      %16 = vector.load %arg6[%c0_14, %c0_15] : memref<384x384xf32, #tpu.memory_space<vmem>>, vector<384x384xf32>
      tpu.vector_store %arg6[%c0_14, %c0_15], %15 {strides = array<i32>} : memref<384x384xf32, #tpu.memory_space<vmem>>, vector<384x384xf32>,
    } else {
    }
    return
  }
  func.func @transform_0(%arg0: i32, %arg1: i32, %arg2: i32) -> (i32, i32) {
    %c0_i32 = arith.constant 0 : i32
    return %arg0, %arg2 : i32, i32
  }
  func.func @transform_1(%arg0: i32, %arg1: i32, %arg2: i32) -> (i32, i32) {
    %c0_i32 = arith.constant 0 : i32
    return %arg2, %arg1 : i32, i32
  }
  func.func @transform_2(%arg0: i32, %arg1: i32, %arg2: i32) -> (i32, i32) {
    %c0_i32 = arith.constant 0 : i32
    %c0_i32_0 = arith.constant 0 : i32
    return %c0_i32, %arg1 : i32, i32
  }
  func.func @transform_3(%arg0: i32, %arg1: i32, %arg2: i32) -> (i32, i32) {
    %c0_i32 = arith.constant 0 : i32
    return %arg0, %arg1 : i32, i32
  }
}

</mosaic_0001>

<bundles_post_ra>
// kernel: tpu_custom_call.1
= control target key start
LH: loop header
LB: loop body
LE: loop exit
PB: predicated region body
PF: predicated region fallthrough
CT: control target
= control target key end

     0   :  { %8 = vsyncpa [#allocation4], 0  ;;  %s2528_s0 = inlined_call_operand.hbm [shape: f32[384,128], index: 0, kind: input, shape index: {}]   ;;  %s2529_s1 = inlined_call_operand.hbm [shape: f32[128,384], index: 1, kind: input, shape index: {}]   ;;  %s2530_s2 = inlined_call_operand.vmem [shape: f32[1,384], index: 2, kind: input, shape index: {}]   ;;  %s2531_s3 = inlined_call_operand.hbm [shape: f32[384,384], index: 3, kind: output, shape index: {}]  }
   0x1   :  { %9 = vsyncpa [#allocation7], 0 }
   0x2   :  { %10 = vsyncpa [#allocation5], 0  ;;  %s2175_s12 = smov [#allocation3]   ;;  %s2103_s16 = scalar_lea.hbm %s2528_s0, 6144 }
   0x3   :  { %s16_s13 = sshll.u32 %s2175_s12, 4  ;;  %p2104_p0 = scmp.ne.s32.totalorder %s2528_s0, %s2103_s16  ;;  %s17_s13 = int_to_ptr.vmem [resolvable:$true] %s16_s13 }
   0x4   :  { %p2107_p1 = scmp.lt.u32.totalorder %s2103_s16, %s2528_s0 }
   0x6   :  { %p2109_p2 = pnand %p2107_p1, %p2104_p0 }
   0x8   :  { %2112 = shalt.err (!%p2109_p2)
}
   0x9   :  { %s2113_s21 = scalar_lea.vmem %s17_s13, 6144  ;;  %p2118_p4 = scmp.lt.s32.totalorder %s17_s13, %s17_s13 }
   0xa   :  { %p2114_p3 = scmp.ne.s32.totalorder %s17_s13, %s2113_s21  ;;  %p2119_p5 = scmp.lt.s32.totalorder %s2113_s21, %s2113_s21 }
   0xc   :  { %p2120_p6 = por %p2119_p5, %p2118_p4 }
   0xe   :  { %p2121_p7 = pnand %p2120_p6, %p2114_p3 }
  0x10   :  { %2124 = shalt.err (!%p2121_p7)
}
  0x11   :  { %s2176_s22 = smov 128   ;;  %s2177_s23 = smov 8  }
  0x12   :  { %22 = dma.hbm_to_vmem [thread:$0]  %s2528_s0, 6144, %s17_s13, [#allocation4], %s2176_s22, %s2176_s22, %s2177_s23  }
  0x13   :  { %s2178_s26 = smov [#allocation6]   ;;  %s2125_s30 = scalar_lea.hbm %s2529_s1, 6144 }
  0x14   :  { %s28_s27 = sshll.u32 %s2178_s26, 4  ;;  %p2126_p8 = scmp.ne.s32.totalorder %s2529_s1, %s2125_s30  ;;  %s29_s27 = int_to_ptr.vmem [resolvable:$true] %s28_s27 }
  0x15   :  { %p2129_p9 = scmp.lt.u32.totalorder %s2125_s30, %s2529_s1 }
  0x17   :  { %p2131_p10 = pnand %p2129_p9, %p2126_p8 }
  0x19   :  { %2134 = shalt.err (!%p2131_p10)
}
  0x1a   :  { %s2135_s8 = scalar_lea.vmem %s29_s27, 6144  ;;  %p2140_p12 = scmp.lt.s32.totalorder %s29_s27, %s29_s27 }
  0x1b   :  { %p2136_p11 = scmp.ne.s32.totalorder %s29_s27, %s2135_s8  ;;  %p2141_p13 = scmp.lt.s32.totalorder %s2135_s8, %s2135_s8 }
  0x1d   :  { %p2142_p0 = por %p2141_p13, %p2140_p12 }
  0x1f   :  { %p2143_p1 = pnand %p2142_p0, %p2136_p11 }
  0x21   :  { %2146 = shalt.err (!%p2143_p1)
}
  0x22   :  { %s2179_s0 = smov 384   ;;  %s2180_s9 = smov 24  }
  0x23   :  { %34 = dma.hbm_to_vmem [thread:$0]  %s2529_s1, 6144, %s29_s27, [#allocation7], %s2179_s0, %s2179_s0, %s2180_s9  }
  0x24   :  { %2169 = dma.done.wait [#allocation4], 6144  }
  0x25   :  { %2170 = vsyncadd [#allocation4], 4294961152 }
  0x26   :  { %2171 = dma.done.wait [#allocation7], 6144  }
  0x27   :  { %2172 = vsyncadd [#allocation7], 4294961152  ;;  %v2181_v0 = vmov 0.0   ;;  %v384_v1 = vld [vmem:[#allocation6 + $0x8] sm:$0xff]  ;;  %v387_v2 = vld [vmem:[#allocation6 + $0x20] sm:$0xff] }
  0x28   :  { %495 = vmatprep.mubr.f32.mxu0 %v2181_v0  ;;  %711 = vmatprep.mubr.f32.mxu1 %v2181_v0  ;;  %v383_v3 = vld [vmem:[#allocation6] sm:$0xff]  ;;  %v2015_v4 = vpack.c.bf16 %v387_v2, %v384_v1  ;;  %v386_v5 = vld [vmem:[#allocation6 + $0x18] sm:$0xff]  ;;  %v393_v7 = vld [vmem:[#allocation6 + $0x50] sm:$0xff] }
  0x29   :  { %v390_v6 = vld [vmem:[#allocation6 + $0x38] sm:$0xff]  ;;  %v2017_v8 = vpack.c.bf16 %v386_v5, %v383_v3  ;;  %v389_v10 = vld [vmem:[#allocation6 + $0x30] sm:$0xff]  ;;  %v392_v11 = vld [vmem:[#allocation6 + $0x48] sm:$0xff] }
  0x2a   :  { %v2019_v9 = vpack.c.bf16 %v393_v7, %v390_v6  ;;  %v396_v12 = vld [vmem:[#allocation6 + $0x68] sm:$0xff]  ;;  %2016 = vmatprep.subr.bf16.mxu0 %v2015_v4  ;;  %2079 = vmatprep.subr.bf16.mxu1 %v2015_v4  ;;  %v399_v13 = vld [vmem:[#allocation6 + $0x80] sm:$0xff]  ;;  %v2021_v14 = vpack.c.bf16 %v392_v11, %v389_v10  ;;  %v398_v17 = vld [vmem:[#allocation6 + $0x78] sm:$0xff] }
  0x2b   :  { %2018 = vmatpush1.bf16.msra.mxu0 %v2017_v8  ;;  %2087 = vmatpush1.bf16.msra.mxu1 %v2017_v8  ;;  %v2023_v15 = vpack.c.bf16 %v399_v13, %v396_v12  ;;  %v395_v16 = vld [vmem:[#allocation6 + $0x60] sm:$0xff]  ;;  %v402_v18 = vld [vmem:[#allocation6 + $0x98] sm:$0xff]  ;;  %v405_v19 = vld [vmem:[#allocation6 + $0xb0] sm:$0xff] }
  0x2c   :  { %2020 = vmatprep.subr.bf16.mxu0 %v2019_v9  ;;  %2080 = vmatprep.subr.bf16.mxu1 %v2019_v9  ;;  %v2025_v20 = vpack.c.bf16 %v398_v17, %v395_v16  ;;  %v2027_v21 = vpack.c.bf16 %v405_v19, %v402_v18  ;;  %v401_v22 = vld [vmem:[#allocation6 + $0x90] sm:$0xff]  ;;  %v404_v23 = vld [vmem:[#allocation6 + $0xa8] sm:$0xff]  ;;  %v411_v25 = vld [vmem:[#allocation6 + $0xe0] sm:$0xff] }
  0x2d   :  { %v408_v24 = vld [vmem:[#allocation6 + $0xc8] sm:$0xff]  ;;  %v2029_v26 = vpack.c.bf16 %v404_v23, %v401_v22  ;;  %v407_v28 = vld [vmem:[#allocation6 + $0xc0] sm:$0xff]  ;;  %v410_v29 = vld [vmem:[#allocation6 + $0xd8] sm:$0xff] }
  0x2e   :  { %v2031_v27 = vpack.c.bf16 %v411_v25, %v408_v24  ;;  %v414_v30 = vld [vmem:[#allocation6 + $0xf8] sm:$0xff]  ;;  %v417_v31 = vld [vmem:[#allocation6 + $0x110] sm:$0xff]  ;;  %v2033_v32 = vpack.c.bf16 %v410_v29, %v407_v28  ;;  %v416_v35 = vld [vmem:[#allocation6 + $0x108] sm:$0xff] }
  0x2f   :  { %2022 = vmatpush1.bf16.msra.mxu0 %v2021_v14  ;;  %2088 = vmatpush1.bf16.msra.mxu1 %v2021_v14  ;;  %v2035_v33 = vpack.c.bf16 %v417_v31, %v414_v30  ;;  %v413_v34 = vld [vmem:[#allocation6 + $0xf0] sm:$0xff]  ;;  %v420_v36 = vld [vmem:[#allocation6 + $0x128] sm:$0xff]  ;;  %v423_v37 = vld [vmem:[#allocation6 + $0x140] sm:$0xff] }
  0x30   :  { %2024 = vmatprep.subr.bf16.mxu0 %v2023_v15  ;;  %2081 = vmatprep.subr.bf16.mxu1 %v2023_v15  ;;  %v2037_v38 = vpack.c.bf16 %v416_v35, %v413_v34  ;;  %v2039_v39 = vpack.c.bf16 %v423_v37, %v420_v36  ;;  %v419_v40 = vld [vmem:[#allocation6 + $0x120] sm:$0xff]  ;;  %v422_v41 = vld [vmem:[#allocation6 + $0x138] sm:$0xff]  ;;  %v429_v43 = vld [vmem:[#allocation6 + $0x170] sm:$0xff] }
  0x31   :  { %v426_v42 = vld [vmem:[#allocation6 + $0x158] sm:$0xff]  ;;  %v2041_v44 = vpack.c.bf16 %v422_v41, %v419_v40  ;;  %v425_v46 = vld [vmem:[#allocation6 + $0x150] sm:$0xff]  ;;  %v428_v47 = vld [vmem:[#allocation6 + $0x168] sm:$0xff] }
  0x32   :  { %v2043_v45 = vpack.c.bf16 %v429_v43, %v426_v42  ;;  %v385_v48 = vld [vmem:[#allocation6 + $0x10] sm:$0xff]  ;;  %v388_v49 = vld [vmem:[#allocation6 + $0x28] sm:$0xff]  ;;  %v2045_v50 = vpack.c.bf16 %v428_v47, %v425_v46  ;;  %v391_v52 = vld [vmem:[#allocation6 + $0x40] sm:$0xff] }
  0x33   :  { %2026 = vmatpush1.bf16.msra.mxu0 %v2025_v20  ;;  %2089 = vmatpush1.bf16.msra.mxu1 %v2025_v20  ;;  %v2047_v51 = vpack.c.bf16 %v388_v49, %v385_v48  ;;  %v394_v53 = vld [vmem:[#allocation6 + $0x58] sm:$0xff]  ;;  %v2232_v54 = vld [vmem:[#allocation3] sm:$0xff]  ;;  %v397_v57 = vld [vmem:[#allocation6 + $0x70] sm:$0xff] }
  0x34   :  { %2028 = vmatprep.subr.bf16.mxu0 %v2027_v21  ;;  %2082 = vmatprep.subr.bf16.mxu1 %v2027_v21  ;;  %v2234_v55 = vld [vmem:[#allocation3 + $0x120] sm:$0xff]  ;;  %v2051_v56 = vpack.c.bf16 %v394_v53, %v391_v52  ;;  %v400_v58 = vld [vmem:[#allocation6 + $0x88] sm:$0xff]  ;;  %v406_v63 = vld [vmem:[#allocation6 + $0xb8] sm:$0xff] }
  0x35   :  { %v2239_v59 = vld [vmem:[#allocation3 + $0x8] sm:$0xff]  ;;  %v2055_v61 = vpack.c.bf16 %v400_v58, %v397_v57  ;;  %v403_v62 = vld [vmem:[#allocation6 + $0xa0] sm:$0xff]  ;;  %v2248_v1 = vld [vmem:[#allocation3 + $0x10] sm:$0xff] }
  0x36   :  { %v2241_v60 = vld [vmem:[#allocation3 + $0x128] sm:$0xff]  ;;  %v2250_v2 = vld [vmem:[#allocation3 + $0x130] sm:$0xff]  ;;  %v2059_v3 = vpack.c.bf16 %v406_v63, %v403_v62  ;;  %v2256_v6 = vld [vmem:[#allocation3 + $0x18] sm:$0xff] }
  0x37   :  { %2030 = vmatpush1.bf16.msra.mxu0 %v2029_v26  ;;  %2090 = vmatpush1.bf16.msra.mxu1 %v2029_v26  ;;  %v409_v4 = vld [vmem:[#allocation6 + $0xd0] sm:$0xff]  ;;  %v412_v5 = vld [vmem:[#allocation6 + $0xe8] sm:$0xff]  ;;  %v2258_v7 = vld [vmem:[#allocation3 + $0x138] sm:$0xff] }
  0x38   :  { %2032 = vmatprep.subr.bf16.mxu0 %v2031_v27  ;;  %2083 = vmatprep.subr.bf16.mxu1 %v2031_v27  ;;  %v2063_v8 = vpack.c.bf16 %v412_v5, %v409_v4  ;;  %v415_v9 = vld [vmem:[#allocation6 + $0x100] sm:$0xff]  ;;  %v418_v10 = vld [vmem:[#allocation6 + $0x118] sm:$0xff]  ;;  %v421_v14 = vld [vmem:[#allocation6 + $0x130] sm:$0xff] }
  0x39   :  { %v2264_v11 = vld [vmem:[#allocation3 + $0x20] sm:$0xff]  ;;  %v2067_v13 = vpack.c.bf16 %v418_v10, %v415_v9  ;;  %v424_v15 = vld [vmem:[#allocation6 + $0x148] sm:$0xff]  ;;  %v430_v20 = vld [vmem:[#allocation6 + $0x178] sm:$0xff] }
  0x3a   :  { %v2266_v12 = vld [vmem:[#allocation3 + $0x140] sm:$0xff]  ;;  %v2272_v16 = vld [vmem:[#allocation3 + $0x28] sm:$0xff]  ;;  %v2071_v18 = vpack.c.bf16 %v424_v15, %v421_v14  ;;  %v341_v21 = vld [vmem:[#allocation3 + $0x30] sm:$0xff] }
  0x3b   :  { %2034 = vmatpush1.bf16.msra.mxu0 %v2033_v32  ;;  %2091 = vmatpush1.bf16.msra.mxu1 %v2033_v32  ;;  %v2274_v17 = vld [vmem:[#allocation3 + $0x148] sm:$0xff]  ;;  %v427_v19 = vld [vmem:[#allocation6 + $0x160] sm:$0xff]  ;;  %v2280_v22 = vld [vmem:[#allocation3 + $0x150] sm:$0xff] }
  0x3c   :  { %2036 = vmatprep.subr.bf16.mxu0 %v2035_v33  ;;  %2084 = vmatprep.subr.bf16.mxu1 %v2035_v33  ;;  %v2075_v23 = vpack.c.bf16 %v430_v20, %v427_v19  ;;  %v342_v24 = vld [vmem:[#allocation3 + $0x38] sm:$0xff]  ;;  %v343_v26 = vld [vmem:[#allocation3 + $0x40] sm:$0xff]  ;;  %v344_v28 = vld [vmem:[#allocation3 + $0x48] sm:$0xff] }
  0x3d   :  { %v2285_v25 = vld [vmem:[#allocation3 + $0x158] sm:$0xff]  ;;  %v2290_v27 = vld [vmem:[#allocation3 + $0x160] sm:$0xff]  ;;  %v2295_v29 = vld [vmem:[#allocation3 + $0x168] sm:$0xff] }
  0x3e   :  { %v345_v30 = vld [vmem:[#allocation3 + $0x50] sm:$0xff]  ;;  %v346_v32 = vld [vmem:[#allocation3 + $0x58] sm:$0xff]  ;;  %v347_v34 = vld [vmem:[#allocation3 + $0x60] sm:$0xff] }
  0x3f   :  { %2038 = vmatpush1.bf16.msra.mxu0 %v2037_v38  ;;  %2092 = vmatpush1.bf16.msra.mxu1 %v2037_v38  ;;  %v2300_v31 = vld [vmem:[#allocation3 + $0x170] sm:$0xff]  ;;  %v2305_v33 = vld [vmem:[#allocation3 + $0x178] sm:$0xff]  ;;  %v348_v35 = vld [vmem:[#allocation3 + $0x68] sm:$0xff] }
  0x40   :  { %2040 = vmatprep.subr.bf16.mxu0 %v2039_v39  ;;  %2085 = vmatprep.subr.bf16.mxu1 %v2039_v39  ;;  %v349_v36 = vld [vmem:[#allocation3 + $0x70] sm:$0xff]  ;;  %v350_v37 = vld [vmem:[#allocation3 + $0x78] sm:$0xff]  ;;  %v351_v38 = vld [vmem:[#allocation3 + $0x80] sm:$0xff] }
  0x41   :  { %v352_v39 = vld [vmem:[#allocation3 + $0x88] sm:$0xff]  ;;  %v353_v40 = vld [vmem:[#allocation3 + $0x90] sm:$0xff]  ;;  %v354_v41 = vld [vmem:[#allocation3 + $0x98] sm:$0xff] }
  0x42   :  { %v355_v42 = vld [vmem:[#allocation3 + $0xa0] sm:$0xff]  ;;  %v356_v43 = vld [vmem:[#allocation3 + $0xa8] sm:$0xff]  ;;  %v361_v48 = vld [vmem:[#allocation3 + $0xd0] sm:$0xff] }
  0x43   :  { %2042 = vmatpush1.bf16.msra.mxu0 %v2041_v44  ;;  %2093 = vmatpush1.bf16.msra.mxu1 %v2041_v44  ;;  %v357_v44 = vld [vmem:[#allocation3 + $0xb0] sm:$0xff]  ;;  %v359_v46 = vld [vmem:[#allocation3 + $0xc0] sm:$0xff]  ;;  %v360_v47 = vld [vmem:[#allocation3 + $0xc8] sm:$0xff] }
  0x44   :  { %2044 = vmatprep.subr.bf16.mxu0 %v2043_v45  ;;  %2086 = vmatprep.subr.bf16.mxu1 %v2043_v45  ;;  %v358_v45 = vld [vmem:[#allocation3 + $0xb8] sm:$0xff]  ;;  %v365_v52 = vld [vmem:[#allocation3 + $0xf0] sm:$0xff] }
  0x45   :  { %v362_v49 = vld [vmem:[#allocation3 + $0xd8] sm:$0xff]  ;;  %v369_v57 = vld [vmem:[#allocation3 + $0x110] sm:$0xff] }
  0x46   :  { %v366_v53 = vld [vmem:[#allocation3 + $0xf8] sm:$0xff] }
  0x47   :  { %2046 = vmatpush1.bf16.msra.mxu0 %v2045_v50  ;;  %2094 = vmatpush1.bf16.msra.mxu1 %v2045_v50  ;;  %v363_v50 = vld [vmem:[#allocation3 + $0xe0] sm:$0xff]  ;;  %v370_v58 = vld [vmem:[#allocation3 + $0x118] sm:$0xff] }
  0x48   :  { %2048 = vmatprep.subr.bf16.mxu1 %v2047_v51 }
  0x4a   :  { %496 = vmatmul.mubr.f32.vlgmr.msra.gmra.mrb[0].mxu0 %v2232_v54  ;;  %712 = vmatmul.mubr.f32.vlgmr.msra.gmra.mrb[0].mxu1 %v2234_v55 }
  0x4b   :  { %2050 = vmatpush3.bf16.msra.mxu1 %v2047_v51  ;;  %501 = vmatprep.mubr.f32.mxu0 %v2181_v0  ;;  %v364_v51 = vld [vmem:[#allocation3 + $0xe8] sm:$0xff] }
  0x4c   :  { %717 = vmatprep.mubr.f32.mxu1 %v2181_v0  ;;  %2052 = vmatprep.subr.bf16.mxu1 %v2051_v56 }
  0x4e   :  { %502 = vmatmul.mubr.f32.gmra.mrb[2].mxu0 %v2239_v59  ;;  %718 = vmatmul.mubr.f32.gmra.mrb[2].mxu1 %v2241_v60 }
  0x4f   :  { %507 = vmatprep.mubr.f32.mxu0 %v2181_v0  ;;  %723 = vmatprep.mubr.f32.mxu1 %v2181_v0 }
  0x50   :  { %2054 = vmatpush3.bf16.msra.mxu1 %v2051_v56  ;;  %v368_v56 = vld [vmem:[#allocation3 + $0x108] sm:$0xff] }
  0x51   :  { %2056 = vmatprep.subr.bf16.mxu1 %v2055_v61 }
  0x52   :  { %508 = vmatmul.mubr.f32.gmra.mrb[4].mxu0 %v2248_v1  ;;  %724 = vmatmul.mubr.f32.gmra.mrb[4].mxu1 %v2250_v2 }
  0x53   :  { %513 = vmatprep.mubr.f32.mxu0 %v2181_v0  ;;  %729 = vmatprep.mubr.f32.mxu1 %v2181_v0 }
  0x54   :  { %2058 = vmatpush3.bf16.msra.mxu1 %v2055_v61  ;;  %v2356_v61 = vld [vmem:[%s2530_s2] sm:$0x7]  ;;  %s2182_s2 = smov [#allocation8]  }
  0x55   :  { %2060 = vmatprep.subr.bf16.mxu1 %v2059_v3  ;;  %s1834_s13 = sshll.u32 %s2182_s2, 4  ;;  %s1835_s13 = int_to_ptr.vmem [resolvable:$true] %s1834_s13 }
  0x56   :  { %514 = vmatmul.mubr.f32.gmra.mrb[6].mxu0 %v2256_v6  ;;  %730 = vmatmul.mubr.f32.gmra.mrb[6].mxu1 %v2258_v7  ;;  %s2147_s14 = scalar_lea.vmem %s1835_s13, 18432  ;;  %p2152_p3 = scmp.lt.s32.totalorder %s1835_s13, %s1835_s13 }
  0x57   :  { %519 = vmatprep.mubr.f32.mxu0 %v2181_v0  ;;  %735 = vmatprep.mubr.f32.mxu1 %v2181_v0  ;;  %p2148_p2 = scmp.ne.s32.totalorder %s1835_s13, %s2147_s14  ;;  %p2153_p4 = scmp.lt.s32.totalorder %s2147_s14, %s2147_s14 }
  0x58   :  { %2062 = vmatpush3.bf16.msra.mxu1 %v2059_v3 }
  0x59   :  { %2064 = vmatprep.subr.bf16.mxu1 %v2063_v8  ;;  %p2154_p5 = por %p2153_p4, %p2152_p3 }
  0x5a   :  { %520 = vmatmul.mubr.f32.gmra.mrb[8].mxu0 %v2264_v11  ;;  %736 = vmatmul.mubr.f32.gmra.mrb[8].mxu1 %v2266_v12 }
  0x5b   :  { %525 = vmatprep.mubr.f32.mxu0 %v2181_v0  ;;  %741 = vmatprep.mubr.f32.mxu1 %v2181_v0  ;;  %p2155_p6 = pnand %p2154_p5, %p2148_p2 }
  0x5c   :  { %2066 = vmatpush3.bf16.msra.mxu1 %v2063_v8 }
  0x5d   :  { %2068 = vmatprep.subr.bf16.mxu1 %v2067_v13 }
  0x5e   :  { %526 = vmatmul.mubr.f32.gmra.mrb[10].mxu0 %v2272_v16  ;;  %742 = vmatmul.mubr.f32.gmra.mrb[10].mxu1 %v2274_v17 }
  0x5f   :  { %531 = vmatprep.mubr.f32.mxu0 %v2181_v0  ;;  %747 = vmatprep.mubr.f32.mxu1 %v2181_v0 }
  0x60   :  { %2070 = vmatpush3.bf16.msra.mxu1 %v2067_v13 }
  0x61   :  { %2072 = vmatprep.subr.bf16.mxu1 %v2071_v18 }
  0x62   :  { %532 = vmatmul.mubr.f32.gmra.mrb[12].mxu0 %v341_v21  ;;  %748 = vmatmul.mubr.f32.gmra.mrb[12].mxu1 %v2280_v22 }
  0x63   :  { %537 = vmatprep.mubr.f32.mxu0 %v2181_v0  ;;  %753 = vmatprep.mubr.f32.mxu1 %v2181_v0 }
  0x64   :  { %2074 = vmatpush3.bf16.msra.mxu1 %v2071_v18 }
  0x65   :  { %2076 = vmatprep.subr.bf16.mxu1 %v2075_v23 }
  0x66   :  { %538 = vmatmul.mubr.f32.gmra.mrb[14].mxu0 %v342_v24  ;;  %754 = vmatmul.mubr.f32.gmra.mrb[14].mxu1 %v2285_v25 }
  0x67   :  { %543 = vmatprep.mubr.f32.mxu0 %v2181_v0  ;;  %759 = vmatprep.mubr.f32.mxu1 %v2181_v0 }
  0x68   :  { %2078 = vmatpush3.bf16.msra.mxu1 %v2075_v23 }
  0x6a   :  { %544 = vmatmul.mubr.f32.gmra.mrb[16].mxu0 %v343_v26  ;;  %760 = vmatmul.mubr.f32.gmra.mrb[16].mxu1 %v2290_v27 }
  0x6b   :  { %549 = vmatprep.mubr.f32.mxu0 %v2181_v0  ;;  %765 = vmatprep.mubr.f32.mxu1 %v2181_v0 }
  0x6e   :  { %550 = vmatmul.mubr.f32.gmra.mrb[18].mxu0 %v344_v28  ;;  %766 = vmatmul.mubr.f32.gmra.mrb[18].mxu1 %v2295_v29 }
  0x6f   :  { %555 = vmatprep.mubr.f32.mxu0 %v2181_v0  ;;  %771 = vmatprep.mubr.f32.mxu1 %v2181_v0 }
  0x72   :  { %556 = vmatmul.mubr.f32.gmra.mrb[20].mxu0 %v345_v30  ;;  %772 = vmatmul.mubr.f32.gmra.mrb[20].mxu1 %v2300_v31 }
  0x73   :  { %561 = vmatprep.mubr.f32.mxu0 %v2181_v0  ;;  %777 = vmatprep.mubr.f32.mxu1 %v2181_v0 }
  0x76   :  { %562 = vmatmul.mubr.f32.gmra.mrb[22].mxu0 %v346_v32  ;;  %778 = vmatmul.mubr.f32.gmra.mrb[22].mxu1 %v2305_v33 }
  0x77   :  { %567 = vmatprep.mubr.f32.mxu0 %v2181_v0  ;;  %1943 = vmatprep.mubr.f32.mxu1 %v2232_v54  ;;  %v367_v54 = vld [vmem:[#allocation3 + $0x100] sm:$0xff] }
  0x7a   :  { %568 = vmatmul.mubr.f32.gmra.mrb[24].mxu0 %v347_v34  ;;  %1944 = vmatmul.mubr.f32.vlgmr.msra.gmra.mrb[24].mxu1 %v2239_v59 }
  0x7b   :  { %573 = vmatprep.mubr.f32.mxu0 %v2181_v0  ;;  %1946 = vmatprep.mubr.f32.mxu1 %v2248_v1 }
  0x7e   :  { %574 = vmatmul.mubr.f32.gmra.mrb[26].mxu0 %v348_v35  ;;  %1947 = vmatmul.mubr.f32.gmra.mrb[26].mxu1 %v2256_v6 }
  0x7f   :  { %579 = vmatprep.mubr.f32.mxu0 %v2181_v0  ;;  %1949 = vmatprep.mubr.f32.mxu1 %v2264_v11 }
  0x82   :  { %580 = vmatmul.mubr.f32.gmra.mrb[28].mxu0 %v349_v36  ;;  %1950 = vmatmul.mubr.f32.gmra.mrb[28].mxu1 %v2272_v16 }
  0x83   :  { %585 = vmatprep.mubr.f32.mxu0 %v2181_v0  ;;  %1952 = vmatprep.mubr.f32.mxu1 %v341_v21 }
  0x86   :  { %586 = vmatmul.mubr.f32.gmra.mrb[30].mxu0 %v350_v37  ;;  %1953 = vmatmul.mubr.f32.gmra.mrb[30].mxu1 %v342_v24 }
  0x87   :  { %591 = vmatprep.mubr.f32.mxu0 %v2181_v0  ;;  %1955 = vmatprep.mubr.f32.mxu1 %v343_v26 }
  0x8a   :  { %592 = vmatmul.mubr.f32.gmra.mrb[32].mxu0 %v351_v38  ;;  %1956 = vmatmul.mubr.f32.gmra.mrb[32].mxu1 %v344_v28 }
  0x8b   :  { %597 = vmatprep.mubr.f32.mxu0 %v2181_v0  ;;  %1958 = vmatprep.mubr.f32.mxu1 %v345_v30 }
  0x8e   :  { %598 = vmatmul.mubr.f32.gmra.mrb[34].mxu0 %v352_v39  ;;  %1959 = vmatmul.mubr.f32.gmra.mrb[34].mxu1 %v346_v32 }
  0x8f   :  { %603 = vmatprep.mubr.f32.mxu0 %v2181_v0  ;;  %1961 = vmatprep.mubr.f32.mxu1 %v347_v34 }
  0x92   :  { %604 = vmatmul.mubr.f32.gmra.mrb[36].mxu0 %v353_v40  ;;  %1962 = vmatmul.mubr.f32.gmra.mrb[36].mxu1 %v348_v35 }
  0x93   :  { %609 = vmatprep.mubr.f32.mxu0 %v2181_v0  ;;  %1964 = vmatprep.mubr.f32.mxu1 %v349_v36 }
  0x96   :  { %610 = vmatmul.mubr.f32.gmra.mrb[38].mxu0 %v354_v41  ;;  %1965 = vmatmul.mubr.f32.gmra.mrb[38].mxu1 %v350_v37 }
  0x97   :  { %615 = vmatprep.mubr.f32.mxu0 %v2181_v0  ;;  %1967 = vmatprep.mubr.f32.mxu1 %v351_v38 }
  0x9a   :  { %616 = vmatmul.mubr.f32.gmra.mrb[40].mxu0 %v355_v42  ;;  %1968 = vmatmul.mubr.f32.gmra.mrb[40].mxu1 %v352_v39 }
  0x9b   :  { %621 = vmatprep.mubr.f32.mxu0 %v2181_v0  ;;  %1970 = vmatprep.mubr.f32.mxu1 %v353_v40 }
  0x9e   :  { %622 = vmatmul.mubr.f32.gmra.mrb[42].mxu0 %v356_v43  ;;  %1971 = vmatmul.mubr.f32.gmra.mrb[42].mxu1 %v354_v41 }
  0x9f   :  { %627 = vmatprep.mubr.f32.mxu0 %v2181_v0  ;;  %1973 = vmatprep.mubr.f32.mxu1 %v355_v42 }
  0xa2   :  { %628 = vmatmul.mubr.f32.gmra.mrb[44].mxu0 %v357_v44  ;;  %1974 = vmatmul.mubr.f32.gmra.mrb[44].mxu1 %v356_v43 }
  0xa3   :  { %633 = vmatprep.mubr.f32.mxu0 %v2181_v0  ;;  %1976 = vmatprep.mubr.f32.mxu1 %v357_v44 }
  0xa6   :  { %634 = vmatmul.mubr.f32.gmra.mrb[46].mxu0 %v358_v45  ;;  %1977 = vmatmul.mubr.f32.gmra.mrb[46].mxu1 %v358_v45 }
  0xa7   :  { %639 = vmatprep.mubr.f32.mxu0 %v2181_v0  ;;  %1979 = vmatprep.mubr.f32.mxu1 %v359_v46 }
  0xaa   :  { %640 = vmatmul.mubr.f32.gmra.mrb[48].mxu0 %v359_v46  ;;  %1980 = vmatmul.mubr.f32.gmra.mrb[48].mxu1 %v360_v47 }
  0xab   :  { %645 = vmatprep.mubr.f32.mxu0 %v2181_v0  ;;  %1982 = vmatprep.mubr.f32.mxu1 %v361_v48 }
  0xae   :  { %646 = vmatmul.mubr.f32.gmra.mrb[50].mxu0 %v360_v47  ;;  %1983 = vmatmul.mubr.f32.gmra.mrb[50].mxu1 %v362_v49 }
  0xaf   :  { %651 = vmatprep.mubr.f32.mxu0 %v2181_v0  ;;  %1985 = vmatprep.mubr.f32.mxu1 %v363_v50 }
  0xb2   :  { %652 = vmatmul.mubr.f32.gmra.mrb[52].mxu0 %v361_v48  ;;  %1986 = vmatmul.mubr.f32.gmra.mrb[52].mxu1 %v364_v51 }
  0xb3   :  { %657 = vmatprep.mubr.f32.mxu0 %v2181_v0  ;;  %1988 = vmatprep.mubr.f32.mxu1 %v365_v52 }
  0xb6   :  { %658 = vmatmul.mubr.f32.gmra.mrb[54].mxu0 %v362_v49  ;;  %1989 = vmatmul.mubr.f32.gmra.mrb[54].mxu1 %v366_v53 }
  0xb7   :  { %663 = vmatprep.mubr.f32.mxu0 %v2181_v0  ;;  %1991 = vmatprep.mubr.f32.mxu1 %v367_v54 }
  0xba   :  { %664 = vmatmul.mubr.f32.gmra.mrb[56].mxu0 %v363_v50  ;;  %1992 = vmatmul.mubr.f32.gmra.mrb[56].mxu1 %v368_v56 }
  0xbb   :  { %669 = vmatprep.mubr.f32.mxu0 %v2181_v0  ;;  %1994 = vmatprep.mubr.f32.mxu1 %v369_v57 }
  0xbe   :  { %670 = vmatmul.mubr.f32.gmra.mrb[58].mxu0 %v364_v51  ;;  %1995 = vmatmul.mubr.f32.gmra.mrb[58].mxu1 %v370_v58 }
  0xbf   :  { %675 = vmatprep.mubr.f32.mxu0 %v2181_v0  ;;  %1997 = vmatprep.mubr.f32.mxu1 %v2234_v55  ;;  %v1526_v55 = vlaneseq }
  0xc1   :  { %v2350_v59 = vshrl.u32 %v1526_v55, 7 }
  0xc2   :  { %676 = vmatmul.mubr.f32.gmra.mrb[60].mxu0 %v365_v52  ;;  %1998 = vmatmul.mubr.f32.gmra.mrb[60].mxu1 %v2241_v60 }
  0xc3   :  { %681 = vmatprep.mubr.f32.mxu0 %v2181_v0  ;;  %2000 = vmatprep.mubr.f32.mxu1 %v2250_v2  ;;  %v1528_v60 = vsub.s32 0, %v2350_v59  ;;  %v1532_v62 = vsub.s32 1, %v2350_v59 }
  0xc5   :  { %v2360_v63 = vrot.slane %v2356_v61, %v1528_v60 }
  0xc6   :  { %682 = vmatmul.mubr.f32.gmra.mrb[62].mxu0 %v366_v53  ;;  %2001 = vmatmul.mubr.f32.gmra.mrb[62].mxu1 %v2258_v7 }
  0xc7   :  { %687 = vmatprep.mubr.f32.mxu0 %v2181_v0  ;;  %2003 = vmatprep.mubr.f32.mxu1 %v2266_v12 }
  0xca   :  { %688 = vmatmul.mubr.f32.gmra.mrb[64].mxu0 %v367_v54  ;;  %2004 = vmatmul.mubr.f32.gmra.mrb[64].mxu1 %v2274_v17 }
  0xcb   :  { %693 = vmatprep.mubr.f32.mxu0 %v2181_v0  ;;  %2006 = vmatprep.mubr.f32.mxu1 %v2280_v22 }
  0xce   :  { %694 = vmatmul.mubr.f32.gmra.mrb[66].mxu0 %v368_v56  ;;  %2007 = vmatmul.mubr.f32.gmra.mrb[66].mxu1 %v2285_v25 }
  0xcf   :  { %699 = vmatprep.mubr.f32.mxu0 %v2181_v0  ;;  %2009 = vmatprep.mubr.f32.mxu1 %v2290_v27 }
  0xd2   :  { %700 = vmatmul.mubr.f32.gmra.mrb[68].mxu0 %v369_v57  ;;  %2010 = vmatmul.mubr.f32.gmra.mrb[68].mxu1 %v2295_v29 }
  0xd3   :  { %705 = vmatprep.mubr.f32.mxu0 %v2181_v0  ;;  %2012 = vmatprep.mubr.f32.mxu1 %v2300_v31  ;;  %v2363_v0 = vrot.slane %v2356_v61, %v1532_v62 }
  0xd6   :  { %706 = vmatmul.mubr.f32.gmra.mrb[70].mxu0 %v370_v58  ;;  %2013 = vmatmul.mubr.f32.gmra.mrb[70].mxu1 %v2305_v33 }
 0x11d   :  { %v497_v1 = vpop.f32.mrb[0].mxu0  ;;  %v713_v2 = vpop.f32.mrb[0].mxu1 }
 0x11e   :  { %v1541_v3 = vadd.f32 %v2360_v63, %v497_v1  ;;  %v1649_v4 = vadd.f32 %v2360_v63, %v713_v2  ;;  %v499_v5 = vpop.f32.mrb[1].mxu0  ;;  %v715_v6 = vpop.f32.mrb[1].mxu1 }
 0x11f   :  { %v1542_v7 = vadd.f32 %v2363_v0, %v499_v5  ;;  %v1650_v8 = vadd.f32 %v2363_v0, %v715_v6 }
 0x120   :  { %1685 = vst [vmem:[#allocation8] sm:$0xff] %v1541_v3  ;;  %1793 = vst [vmem:[#allocation8 + $0x360] sm:$0xff] %v1649_v4 }
 0x121   :  { %1686 = vst [vmem:[#allocation8 + $0x8] sm:$0xff] %v1542_v7  ;;  %1794 = vst [vmem:[#allocation8 + $0x368] sm:$0xff] %v1650_v8  ;;  %v503_v9 = vpop.f32.mrb[2].mxu0  ;;  %v719_v10 = vpop.f32.mrb[2].mxu1 }
 0x122   :  { %v1544_v11 = vadd.f32 %v2360_v63, %v503_v9  ;;  %v1652_v12 = vadd.f32 %v2360_v63, %v719_v10  ;;  %v505_v13 = vpop.f32.mrb[3].mxu0  ;;  %v721_v14 = vpop.f32.mrb[3].mxu1 }
 0x123   :  { %v1545_v15 = vadd.f32 %v2363_v0, %v505_v13  ;;  %v1653_v16 = vadd.f32 %v2363_v0, %v721_v14 }
 0x124   :  { %1688 = vst [vmem:[#allocation8 + $0x18] sm:$0xff] %v1544_v11  ;;  %1796 = vst [vmem:[#allocation8 + $0x378] sm:$0xff] %v1652_v12 }
 0x125   :  { %1689 = vst [vmem:[#allocation8 + $0x20] sm:$0xff] %v1545_v15  ;;  %1797 = vst [vmem:[#allocation8 + $0x380] sm:$0xff] %v1653_v16  ;;  %v509_v17 = vpop.f32.mrb[4].mxu0  ;;  %v725_v18 = vpop.f32.mrb[4].mxu1 }
 0x126   :  { %v1547_v19 = vadd.f32 %v2360_v63, %v509_v17  ;;  %v1655_v20 = vadd.f32 %v2360_v63, %v725_v18  ;;  %v511_v21 = vpop.f32.mrb[5].mxu0  ;;  %v727_v22 = vpop.f32.mrb[5].mxu1 }
 0x127   :  { %v1548_v23 = vadd.f32 %v2363_v0, %v511_v21  ;;  %v1656_v24 = vadd.f32 %v2363_v0, %v727_v22 }
 0x128   :  { %1691 = vst [vmem:[#allocation8 + $0x30] sm:$0xff] %v1547_v19  ;;  %1799 = vst [vmem:[#allocation8 + $0x390] sm:$0xff] %v1655_v20 }
 0x129   :  { %1692 = vst [vmem:[#allocation8 + $0x38] sm:$0xff] %v1548_v23  ;;  %1800 = vst [vmem:[#allocation8 + $0x398] sm:$0xff] %v1656_v24  ;;  %v515_v25 = vpop.f32.mrb[6].mxu0  ;;  %v731_v26 = vpop.f32.mrb[6].mxu1 }
 0x12a   :  { %v1550_v27 = vadd.f32 %v2360_v63, %v515_v25  ;;  %v1658_v28 = vadd.f32 %v2360_v63, %v731_v26  ;;  %v517_v29 = vpop.f32.mrb[7].mxu0  ;;  %v733_v30 = vpop.f32.mrb[7].mxu1 }
 0x12b   :  { %v1551_v31 = vadd.f32 %v2363_v0, %v517_v29  ;;  %v1659_v32 = vadd.f32 %v2363_v0, %v733_v30 }
 0x12c   :  { %1694 = vst [vmem:[#allocation8 + $0x48] sm:$0xff] %v1550_v27  ;;  %1802 = vst [vmem:[#allocation8 + $0x3a8] sm:$0xff] %v1658_v28  ;;  %v1536_v27 = vsub.s32 2, %v2350_v59 }
 0x12d   :  { %1695 = vst [vmem:[#allocation8 + $0x50] sm:$0xff] %v1551_v31  ;;  %1803 = vst [vmem:[#allocation8 + $0x3b0] sm:$0xff] %v1659_v32  ;;  %v521_v33 = vpop.f32.mrb[8].mxu0  ;;  %v737_v34 = vpop.f32.mrb[8].mxu1 }
 0x12e   :  { %v1553_v35 = vadd.f32 %v2360_v63, %v521_v33  ;;  %v1661_v36 = vadd.f32 %v2360_v63, %v737_v34  ;;  %v523_v37 = vpop.f32.mrb[9].mxu0  ;;  %v739_v38 = vpop.f32.mrb[9].mxu1 }
 0x12f   :  { %v1554_v39 = vadd.f32 %v2363_v0, %v523_v37  ;;  %v1662_v40 = vadd.f32 %v2363_v0, %v739_v38 }
 0x130   :  { %1697 = vst [vmem:[#allocation8 + $0x60] sm:$0xff] %v1553_v35  ;;  %1805 = vst [vmem:[#allocation8 + $0x3c0] sm:$0xff] %v1661_v36  ;;  %v2413_v36 = vrot.slane %v2356_v61, %v1536_v27 }
 0x131   :  { %1698 = vst [vmem:[#allocation8 + $0x68] sm:$0xff] %v1554_v39  ;;  %1806 = vst [vmem:[#allocation8 + $0x3c8] sm:$0xff] %v1662_v40  ;;  %v527_v41 = vpop.f32.mrb[10].mxu0  ;;  %v743_v42 = vpop.f32.mrb[10].mxu1 }
 0x132   :  { %v1556_v43 = vadd.f32 %v2360_v63, %v527_v41  ;;  %v1664_v44 = vadd.f32 %v2360_v63, %v743_v42  ;;  %v529_v45 = vpop.f32.mrb[11].mxu0  ;;  %v745_v46 = vpop.f32.mrb[11].mxu1 }
 0x133   :  { %v1557_v47 = vadd.f32 %v2363_v0, %v529_v45  ;;  %v1665_v48 = vadd.f32 %v2363_v0, %v745_v46 }
 0x134   :  { %1700 = vst [vmem:[#allocation8 + $0x78] sm:$0xff] %v1556_v43  ;;  %1808 = vst [vmem:[#allocation8 + $0x3d8] sm:$0xff] %v1664_v44 }
 0x135   :  { %1701 = vst [vmem:[#allocation8 + $0x80] sm:$0xff] %v1557_v47  ;;  %1809 = vst [vmem:[#allocation8 + $0x3e0] sm:$0xff] %v1665_v48  ;;  %v533_v49 = vpop.f32.mrb[12].mxu0  ;;  %v749_v50 = vpop.f32.mrb[12].mxu1 }
 0x136   :  { %v1559_v51 = vadd.f32 %v2360_v63, %v533_v49  ;;  %v1667_v52 = vadd.f32 %v2360_v63, %v749_v50  ;;  %v535_v53 = vpop.f32.mrb[13].mxu0  ;;  %v751_v54 = vpop.f32.mrb[13].mxu1 }
 0x137   :  { %v1560_v56 = vadd.f32 %v2363_v0, %v535_v53  ;;  %v1668_v57 = vadd.f32 %v2363_v0, %v751_v54 }
 0x138   :  { %1703 = vst [vmem:[#allocation8 + $0x90] sm:$0xff] %v1559_v51  ;;  %1811 = vst [vmem:[#allocation8 + $0x3f0] sm:$0xff] %v1667_v52 }
 0x139   :  { %1704 = vst [vmem:[#allocation8 + $0x98] sm:$0xff] %v1560_v56  ;;  %1812 = vst [vmem:[#allocation8 + $0x3f8] sm:$0xff] %v1668_v57  ;;  %v539_v58 = vpop.f32.mrb[14].mxu0  ;;  %v755_v55 = vpop.f32.mrb[14].mxu1 }
 0x13a   :  { %v1562_v60 = vadd.f32 %v2360_v63, %v539_v58  ;;  %v1670_v62 = vadd.f32 %v2360_v63, %v755_v55  ;;  %v541_v1 = vpop.f32.mrb[15].mxu0  ;;  %v757_v2 = vpop.f32.mrb[15].mxu1 }
 0x13b   :  { %v1563_v3 = vadd.f32 %v2363_v0, %v541_v1  ;;  %v1671_v4 = vadd.f32 %v2363_v0, %v757_v2 }
 0x13c   :  { %1706 = vst [vmem:[#allocation8 + $0xa8] sm:$0xff] %v1562_v60  ;;  %1814 = vst [vmem:[#allocation8 + $0x408] sm:$0xff] %v1670_v62 }
 0x13d   :  { %1707 = vst [vmem:[#allocation8 + $0xb0] sm:$0xff] %v1563_v3  ;;  %1815 = vst [vmem:[#allocation8 + $0x410] sm:$0xff] %v1671_v4  ;;  %v545_v5 = vpop.f32.mrb[16].mxu0  ;;  %v761_v6 = vpop.f32.mrb[16].mxu1 }
 0x13e   :  { %v1565_v7 = vadd.f32 %v2360_v63, %v545_v5  ;;  %v1673_v8 = vadd.f32 %v2360_v63, %v761_v6  ;;  %v547_v9 = vpop.f32.mrb[17].mxu0  ;;  %v763_v10 = vpop.f32.mrb[17].mxu1 }
 0x13f   :  { %v1566_v11 = vadd.f32 %v2363_v0, %v547_v9  ;;  %v1674_v12 = vadd.f32 %v2363_v0, %v763_v10 }
 0x140   :  { %1709 = vst [vmem:[#allocation8 + $0xc0] sm:$0xff] %v1565_v7  ;;  %1817 = vst [vmem:[#allocation8 + $0x420] sm:$0xff] %v1673_v8 }
 0x141   :  { %1710 = vst [vmem:[#allocation8 + $0xc8] sm:$0xff] %v1566_v11  ;;  %1818 = vst [vmem:[#allocation8 + $0x428] sm:$0xff] %v1674_v12  ;;  %v551_v13 = vpop.f32.mrb[18].mxu0  ;;  %v767_v14 = vpop.f32.mrb[18].mxu1 }
 0x142   :  { %v1568_v15 = vadd.f32 %v2360_v63, %v551_v13  ;;  %v1676_v16 = vadd.f32 %v2360_v63, %v767_v14  ;;  %v553_v17 = vpop.f32.mrb[19].mxu0  ;;  %v769_v18 = vpop.f32.mrb[19].mxu1 }
 0x143   :  { %v1569_v19 = vadd.f32 %v2363_v0, %v553_v17  ;;  %v1677_v20 = vadd.f32 %v2363_v0, %v769_v18 }
 0x144   :  { %1712 = vst [vmem:[#allocation8 + $0xd8] sm:$0xff] %v1568_v15  ;;  %1820 = vst [vmem:[#allocation8 + $0x438] sm:$0xff] %v1676_v16 }
 0x145   :  { %1713 = vst [vmem:[#allocation8 + $0xe0] sm:$0xff] %v1569_v19  ;;  %1821 = vst [vmem:[#allocation8 + $0x440] sm:$0xff] %v1677_v20  ;;  %v557_v21 = vpop.f32.mrb[20].mxu0  ;;  %v773_v22 = vpop.f32.mrb[20].mxu1 }
 0x146   :  { %v1571_v23 = vadd.f32 %v2360_v63, %v557_v21  ;;  %v1679_v24 = vadd.f32 %v2360_v63, %v773_v22  ;;  %v559_v25 = vpop.f32.mrb[21].mxu0  ;;  %v775_v26 = vpop.f32.mrb[21].mxu1 }
 0x147   :  { %v1572_v28 = vadd.f32 %v2363_v0, %v559_v25  ;;  %v1680_v29 = vadd.f32 %v2363_v0, %v775_v26 }
 0x148   :  { %1715 = vst [vmem:[#allocation8 + $0xf0] sm:$0xff] %v1571_v23  ;;  %1823 = vst [vmem:[#allocation8 + $0x450] sm:$0xff] %v1679_v24 }
 0x149   :  { %1716 = vst [vmem:[#allocation8 + $0xf8] sm:$0xff] %v1572_v28  ;;  %1824 = vst [vmem:[#allocation8 + $0x458] sm:$0xff] %v1680_v29  ;;  %v563_v30 = vpop.f32.mrb[22].mxu0  ;;  %v779_v31 = vpop.f32.mrb[22].mxu1 }
 0x14a   :  { %v1574_v32 = vadd.f32 %v2360_v63, %v563_v30  ;;  %v1682_v33 = vadd.f32 %v2360_v63, %v779_v31  ;;  %v565_v34 = vpop.f32.mrb[23].mxu0  ;;  %v781_v35 = vpop.f32.mrb[23].mxu1 }
 0x14b   :  { %v1575_v59 = vadd.f32 %v2363_v0, %v565_v34  ;;  %v1683_v37 = vadd.f32 %v2363_v0, %v781_v35 }
 0x14c   :  { %1718 = vst [vmem:[#allocation8 + $0x108] sm:$0xff] %v1574_v32  ;;  %1826 = vst [vmem:[#allocation8 + $0x468] sm:$0xff] %v1682_v33 }
 0x14d   :  { %1719 = vst [vmem:[#allocation8 + $0x110] sm:$0xff] %v1575_v59  ;;  %1827 = vst [vmem:[#allocation8 + $0x470] sm:$0xff] %v1683_v37  ;;  %v569_v38 = vpop.f32.mrb[24].mxu0  ;;  %v1945_v39 = vpop.f32.mrb[24].mxu1 }
 0x14e   :  { %v1577_v40 = vadd.f32 %v2360_v63, %v569_v38  ;;  %v1546_v41 = vadd.f32 %v1945_v39, %v2413_v36  ;;  %v571_v42 = vpop.f32.mrb[25].mxu0  ;;  %v850_v43 = vpop.f32.mrb[25].mxu1 }
 0x14f   :  { %v1578_v44 = vadd.f32 %v2363_v0, %v571_v42  ;;  %v1543_v61 = vadd.f32 %v2413_v36, %v850_v43 }
 0x150   :  { %1721 = vst [vmem:[#allocation8 + $0x120] sm:$0xff] %v1577_v40  ;;  %1690 = vst [vmem:[#allocation8 + $0x28] sm:$0xff] %v1546_v41 }
 0x151   :  { %1722 = vst [vmem:[#allocation8 + $0x128] sm:$0xff] %v1578_v44  ;;  %1687 = vst [vmem:[#allocation8 + $0x10] sm:$0xff] %v1543_v61  ;;  %v575_v45 = vpop.f32.mrb[26].mxu0  ;;  %v1948_v46 = vpop.f32.mrb[26].mxu1 }
 0x152   :  { %v1580_v47 = vadd.f32 %v2360_v63, %v575_v45  ;;  %v1552_v48 = vadd.f32 %v1948_v46, %v2413_v36  ;;  %v577_v49 = vpop.f32.mrb[27].mxu0  ;;  %v860_v50 = vpop.f32.mrb[27].mxu1 }
 0x153   :  { %v1581_v51 = vadd.f32 %v2363_v0, %v577_v49  ;;  %v1549_v52 = vadd.f32 %v2413_v36, %v860_v50 }
 0x154   :  { %1724 = vst [vmem:[#allocation8 + $0x138] sm:$0xff] %v1580_v47  ;;  %1696 = vst [vmem:[#allocation8 + $0x58] sm:$0xff] %v1552_v48 }
 0x155   :  { %1725 = vst [vmem:[#allocation8 + $0x140] sm:$0xff] %v1581_v51  ;;  %1693 = vst [vmem:[#allocation8 + $0x40] sm:$0xff] %v1549_v52  ;;  %v581_v53 = vpop.f32.mrb[28].mxu0  ;;  %v1951_v54 = vpop.f32.mrb[28].mxu1 }
 0x156   :  { %v1583_v56 = vadd.f32 %v2360_v63, %v581_v53  ;;  %v1558_v57 = vadd.f32 %v1951_v54, %v2413_v36  ;;  %v583_v58 = vpop.f32.mrb[29].mxu0  ;;  %v870_v55 = vpop.f32.mrb[29].mxu1 }
 0x157   :  { %v1584_v60 = vadd.f32 %v2363_v0, %v583_v58  ;;  %v1555_v62 = vadd.f32 %v2413_v36, %v870_v55 }
 0x158   :  { %1727 = vst [vmem:[#allocation8 + $0x150] sm:$0xff] %v1583_v56  ;;  %1702 = vst [vmem:[#allocation8 + $0x88] sm:$0xff] %v1558_v57 }
 0x159   :  { %1728 = vst [vmem:[#allocation8 + $0x158] sm:$0xff] %v1584_v60  ;;  %1699 = vst [vmem:[#allocation8 + $0x70] sm:$0xff] %v1555_v62  ;;  %v587_v1 = vpop.f32.mrb[30].mxu0  ;;  %v1954_v2 = vpop.f32.mrb[30].mxu1 }
 0x15a   :  { %v1586_v3 = vadd.f32 %v2360_v63, %v587_v1  ;;  %v1564_v4 = vadd.f32 %v1954_v2, %v2413_v36  ;;  %v589_v5 = vpop.f32.mrb[31].mxu0  ;;  %v880_v6 = vpop.f32.mrb[31].mxu1 }
 0x15b   :  { %v1587_v7 = vadd.f32 %v2363_v0, %v589_v5  ;;  %v1561_v8 = vadd.f32 %v2413_v36, %v880_v6 }
 0x15c   :  { %1730 = vst [vmem:[#allocation8 + $0x168] sm:$0xff] %v1586_v3  ;;  %1708 = vst [vmem:[#allocation8 + $0xb8] sm:$0xff] %v1564_v4 }
 0x15d   :  { %1731 = vst [vmem:[#allocation8 + $0x170] sm:$0xff] %v1587_v7  ;;  %1705 = vst [vmem:[#allocation8 + $0xa0] sm:$0xff] %v1561_v8  ;;  %v593_v9 = vpop.f32.mrb[32].mxu0  ;;  %v1957_v10 = vpop.f32.mrb[32].mxu1 }
 0x15e   :  { %v1589_v11 = vadd.f32 %v2360_v63, %v593_v9  ;;  %v1570_v12 = vadd.f32 %v1957_v10, %v2413_v36  ;;  %v595_v13 = vpop.f32.mrb[33].mxu0  ;;  %v890_v14 = vpop.f32.mrb[33].mxu1 }
 0x15f   :  { %v1590_v15 = vadd.f32 %v2363_v0, %v595_v13  ;;  %v1567_v16 = vadd.f32 %v2413_v36, %v890_v14 }
 0x160   :  { %1733 = vst [vmem:[#allocation8 + $0x180] sm:$0xff] %v1589_v11  ;;  %1714 = vst [vmem:[#allocation8 + $0xe8] sm:$0xff] %v1570_v12 }
 0x161   :  { %1734 = vst [vmem:[#allocation8 + $0x188] sm:$0xff] %v1590_v15  ;;  %1711 = vst [vmem:[#allocation8 + $0xd0] sm:$0xff] %v1567_v16  ;;  %v599_v17 = vpop.f32.mrb[34].mxu0  ;;  %v1960_v18 = vpop.f32.mrb[34].mxu1 }
 0x162   :  { %v1592_v19 = vadd.f32 %v2360_v63, %v599_v17  ;;  %v1576_v20 = vadd.f32 %v1960_v18, %v2413_v36  ;;  %v601_v21 = vpop.f32.mrb[35].mxu0  ;;  %v900_v22 = vpop.f32.mrb[35].mxu1 }
 0x163   :  { %v1593_v23 = vadd.f32 %v2363_v0, %v601_v21  ;;  %v1573_v24 = vadd.f32 %v2413_v36, %v900_v22 }
 0x164   :  { %1736 = vst [vmem:[#allocation8 + $0x198] sm:$0xff] %v1592_v19  ;;  %1720 = vst [vmem:[#allocation8 + $0x118] sm:$0xff] %v1576_v20 }
 0x165   :  { %1737 = vst [vmem:[#allocation8 + $0x1a0] sm:$0xff] %v1593_v23  ;;  %1717 = vst [vmem:[#allocation8 + $0x100] sm:$0xff] %v1573_v24  ;;  %v605_v25 = vpop.f32.mrb[36].mxu0  ;;  %v1963_v26 = vpop.f32.mrb[36].mxu1 }
 0x166   :  { %v1595_v27 = vadd.f32 %v2360_v63, %v605_v25  ;;  %v1582_v28 = vadd.f32 %v1963_v26, %v2413_v36  ;;  %v607_v29 = vpop.f32.mrb[37].mxu0  ;;  %v910_v30 = vpop.f32.mrb[37].mxu1 }
 0x167   :  { %v1596_v31 = vadd.f32 %v2363_v0, %v607_v29  ;;  %v1579_v32 = vadd.f32 %v2413_v36, %v910_v30 }
 0x168   :  { %1739 = vst [vmem:[#allocation8 + $0x1b0] sm:$0xff] %v1595_v27  ;;  %1726 = vst [vmem:[#allocation8 + $0x148] sm:$0xff] %v1582_v28 }
 0x169   :  { %1740 = vst [vmem:[#allocation8 + $0x1b8] sm:$0xff] %v1596_v31  ;;  %1723 = vst [vmem:[#allocation8 + $0x130] sm:$0xff] %v1579_v32  ;;  %v611_v33 = vpop.f32.mrb[38].mxu0  ;;  %v1966_v34 = vpop.f32.mrb[38].mxu1 }
 0x16a   :  { %v1598_v35 = vadd.f32 %v2360_v63, %v611_v33  ;;  %v1588_v59 = vadd.f32 %v1966_v34, %v2413_v36  ;;  %v613_v37 = vpop.f32.mrb[39].mxu0  ;;  %v920_v38 = vpop.f32.mrb[39].mxu1 }
 0x16b   :  { %v1599_v39 = vadd.f32 %v2363_v0, %v613_v37  ;;  %v1585_v40 = vadd.f32 %v2413_v36, %v920_v38 }
 0x16c   :  { %1742 = vst [vmem:[#allocation8 + $0x1c8] sm:$0xff] %v1598_v35  ;;  %1732 = vst [vmem:[#allocation8 + $0x178] sm:$0xff] %v1588_v59 }
 0x16d   :  { %1743 = vst [vmem:[#allocation8 + $0x1d0] sm:$0xff] %v1599_v39  ;;  %1729 = vst [vmem:[#allocation8 + $0x160] sm:$0xff] %v1585_v40  ;;  %v617_v41 = vpop.f32.mrb[40].mxu0  ;;  %v1969_v42 = vpop.f32.mrb[40].mxu1 }
 0x16e   :  { %v1601_v43 = vadd.f32 %v2360_v63, %v617_v41  ;;  %v1594_v44 = vadd.f32 %v1969_v42, %v2413_v36  ;;  %v619_v61 = vpop.f32.mrb[41].mxu0  ;;  %v930_v45 = vpop.f32.mrb[41].mxu1 }
 0x16f   :  { %v1602_v46 = vadd.f32 %v2363_v0, %v619_v61  ;;  %v1591_v47 = vadd.f32 %v2413_v36, %v930_v45 }
 0x170   :  { %1745 = vst [vmem:[#allocation8 + $0x1e0] sm:$0xff] %v1601_v43  ;;  %1738 = vst [vmem:[#allocation8 + $0x1a8] sm:$0xff] %v1594_v44 }
 0x171   :  { %1746 = vst [vmem:[#allocation8 + $0x1e8] sm:$0xff] %v1602_v46  ;;  %1735 = vst [vmem:[#allocation8 + $0x190] sm:$0xff] %v1591_v47  ;;  %v623_v48 = vpop.f32.mrb[42].mxu0  ;;  %v1972_v49 = vpop.f32.mrb[42].mxu1 }
 0x172   :  { %v1604_v50 = vadd.f32 %v2360_v63, %v623_v48  ;;  %v1600_v51 = vadd.f32 %v1972_v49, %v2413_v36  ;;  %v625_v52 = vpop.f32.mrb[43].mxu0  ;;  %v940_v53 = vpop.f32.mrb[43].mxu1 }
 0x173   :  { %v1605_v54 = vadd.f32 %v2363_v0, %v625_v52  ;;  %v1597_v56 = vadd.f32 %v2413_v36, %v940_v53 }
 0x174   :  { %1748 = vst [vmem:[#allocation8 + $0x1f8] sm:$0xff] %v1604_v50  ;;  %1744 = vst [vmem:[#allocation8 + $0x1d8] sm:$0xff] %v1600_v51 }
 0x175   :  { %1749 = vst [vmem:[#allocation8 + $0x200] sm:$0xff] %v1605_v54  ;;  %1741 = vst [vmem:[#allocation8 + $0x1c0] sm:$0xff] %v1597_v56  ;;  %v629_v57 = vpop.f32.mrb[44].mxu0  ;;  %v1975_v58 = vpop.f32.mrb[44].mxu1 }
 0x176   :  { %v1607_v55 = vadd.f32 %v2360_v63, %v629_v57  ;;  %v1606_v60 = vadd.f32 %v1975_v58, %v2413_v36  ;;  %v631_v62 = vpop.f32.mrb[45].mxu0  ;;  %v950_v1 = vpop.f32.mrb[45].mxu1 }
 0x177   :  { %v1608_v2 = vadd.f32 %v2363_v0, %v631_v62  ;;  %v1603_v3 = vadd.f32 %v2413_v36, %v950_v1 }
 0x178   :  { %1751 = vst [vmem:[#allocation8 + $0x210] sm:$0xff] %v1607_v55  ;;  %1750 = vst [vmem:[#allocation8 + $0x208] sm:$0xff] %v1606_v60 }
 0x179   :  { %1752 = vst [vmem:[#allocation8 + $0x218] sm:$0xff] %v1608_v2  ;;  %1747 = vst [vmem:[#allocation8 + $0x1f0] sm:$0xff] %v1603_v3  ;;  %v635_v4 = vpop.f32.mrb[46].mxu0  ;;  %v1978_v5 = vpop.f32.mrb[46].mxu1 }
 0x17a   :  { %v1610_v6 = vadd.f32 %v2360_v63, %v635_v4  ;;  %v1612_v7 = vadd.f32 %v1978_v5, %v2413_v36  ;;  %v637_v8 = vpop.f32.mrb[47].mxu0  ;;  %v960_v9 = vpop.f32.mrb[47].mxu1 }
 0x17b   :  { %v1611_v10 = vadd.f32 %v2363_v0, %v637_v8  ;;  %v1609_v11 = vadd.f32 %v2413_v36, %v960_v9 }
 0x17c   :  { %1754 = vst [vmem:[#allocation8 + $0x228] sm:$0xff] %v1610_v6  ;;  %1756 = vst [vmem:[#allocation8 + $0x238] sm:$0xff] %v1612_v7 }
 0x17d   :  { %1755 = vst [vmem:[#allocation8 + $0x230] sm:$0xff] %v1611_v10  ;;  %1753 = vst [vmem:[#allocation8 + $0x220] sm:$0xff] %v1609_v11  ;;  %v641_v12 = vpop.f32.mrb[48].mxu0  ;;  %v1981_v13 = vpop.f32.mrb[48].mxu1 }
 0x17e   :  { %v1613_v14 = vadd.f32 %v2360_v63, %v641_v12  ;;  %v1618_v15 = vadd.f32 %v1981_v13, %v2413_v36  ;;  %v643_v16 = vpop.f32.mrb[49].mxu0  ;;  %v970_v17 = vpop.f32.mrb[49].mxu1 }
 0x17f   :  { %v1614_v18 = vadd.f32 %v2363_v0, %v643_v16  ;;  %v1615_v19 = vadd.f32 %v2413_v36, %v970_v17 }
 0x180   :  { %1757 = vst [vmem:[#allocation8 + $0x240] sm:$0xff] %v1613_v14  ;;  %1762 = vst [vmem:[#allocation8 + $0x268] sm:$0xff] %v1618_v15 }
 0x181   :  { %1758 = vst [vmem:[#allocation8 + $0x248] sm:$0xff] %v1614_v18  ;;  %1759 = vst [vmem:[#allocation8 + $0x250] sm:$0xff] %v1615_v19  ;;  %v647_v20 = vpop.f32.mrb[50].mxu0  ;;  %v1984_v21 = vpop.f32.mrb[50].mxu1 }
 0x182   :  { %v1616_v22 = vadd.f32 %v2360_v63, %v647_v20  ;;  %v1624_v23 = vadd.f32 %v1984_v21, %v2413_v36  ;;  %v649_v24 = vpop.f32.mrb[51].mxu0  ;;  %v980_v25 = vpop.f32.mrb[51].mxu1 }
 0x183   :  { %v1617_v26 = vadd.f32 %v2363_v0, %v649_v24  ;;  %v1621_v27 = vadd.f32 %v2413_v36, %v980_v25 }
 0x184   :  { %1760 = vst [vmem:[#allocation8 + $0x258] sm:$0xff] %v1616_v22  ;;  %1768 = vst [vmem:[#allocation8 + $0x298] sm:$0xff] %v1624_v23 }
 0x185   :  { %1761 = vst [vmem:[#allocation8 + $0x260] sm:$0xff] %v1617_v26  ;;  %1765 = vst [vmem:[#allocation8 + $0x280] sm:$0xff] %v1621_v27  ;;  %v653_v28 = vpop.f32.mrb[52].mxu0  ;;  %v1987_v29 = vpop.f32.mrb[52].mxu1 }
 0x186   :  { %v1619_v30 = vadd.f32 %v2360_v63, %v653_v28  ;;  %v1630_v31 = vadd.f32 %v1987_v29, %v2413_v36  ;;  %v655_v32 = vpop.f32.mrb[53].mxu0  ;;  %v990_v33 = vpop.f32.mrb[53].mxu1 }
 0x187   :  { %v1620_v34 = vadd.f32 %v2363_v0, %v655_v32  ;;  %v1627_v35 = vadd.f32 %v2413_v36, %v990_v33 }
 0x188   :  { %1763 = vst [vmem:[#allocation8 + $0x270] sm:$0xff] %v1619_v30  ;;  %1774 = vst [vmem:[#allocation8 + $0x2c8] sm:$0xff] %v1630_v31 }
 0x189   :  { %1764 = vst [vmem:[#allocation8 + $0x278] sm:$0xff] %v1620_v34  ;;  %1771 = vst [vmem:[#allocation8 + $0x2b0] sm:$0xff] %v1627_v35  ;;  %v659_v59 = vpop.f32.mrb[54].mxu0  ;;  %v1990_v37 = vpop.f32.mrb[54].mxu1 }
 0x18a   :  { %v1622_v38 = vadd.f32 %v2360_v63, %v659_v59  ;;  %v1636_v39 = vadd.f32 %v1990_v37, %v2413_v36  ;;  %v661_v40 = vpop.f32.mrb[55].mxu0  ;;  %v1000_v41 = vpop.f32.mrb[55].mxu1 }
 0x18b   :  { %v1623_v42 = vadd.f32 %v2363_v0, %v661_v40  ;;  %v1633_v43 = vadd.f32 %v2413_v36, %v1000_v41 }
 0x18c   :  { %1766 = vst [vmem:[#allocation8 + $0x288] sm:$0xff] %v1622_v38  ;;  %1780 = vst [vmem:[#allocation8 + $0x2f8] sm:$0xff] %v1636_v39 }
 0x18d   :  { %1767 = vst [vmem:[#allocation8 + $0x290] sm:$0xff] %v1623_v42  ;;  %1777 = vst [vmem:[#allocation8 + $0x2e0] sm:$0xff] %v1633_v43  ;;  %v665_v44 = vpop.f32.mrb[56].mxu0  ;;  %v1993_v61 = vpop.f32.mrb[56].mxu1 }
 0x18e   :  { %v1625_v45 = vadd.f32 %v2360_v63, %v665_v44  ;;  %v1642_v46 = vadd.f32 %v1993_v61, %v2413_v36  ;;  %v667_v47 = vpop.f32.mrb[57].mxu0  ;;  %v1010_v48 = vpop.f32.mrb[57].mxu1 }
 0x18f   :  { %v1626_v49 = vadd.f32 %v2363_v0, %v667_v47  ;;  %v1639_v50 = vadd.f32 %v2413_v36, %v1010_v48 }
 0x190   :  { %1769 = vst [vmem:[#allocation8 + $0x2a0] sm:$0xff] %v1625_v45  ;;  %1786 = vst [vmem:[#allocation8 + $0x328] sm:$0xff] %v1642_v46 }
 0x191   :  { %1770 = vst [vmem:[#allocation8 + $0x2a8] sm:$0xff] %v1626_v49  ;;  %1783 = vst [vmem:[#allocation8 + $0x310] sm:$0xff] %v1639_v50  ;;  %v671_v51 = vpop.f32.mrb[58].mxu0  ;;  %v1996_v52 = vpop.f32.mrb[58].mxu1 }
 0x192   :  { %v1628_v53 = vadd.f32 %v2360_v63, %v671_v51  ;;  %v1648_v54 = vadd.f32 %v1996_v52, %v2413_v36  ;;  %v673_v56 = vpop.f32.mrb[59].mxu0  ;;  %v1020_v57 = vpop.f32.mrb[59].mxu1 }
 0x193   :  { %v1629_v58 = vadd.f32 %v2363_v0, %v673_v56  ;;  %v1645_v55 = vadd.f32 %v2413_v36, %v1020_v57 }
 0x194   :  { %1772 = vst [vmem:[#allocation8 + $0x2b8] sm:$0xff] %v1628_v53  ;;  %1792 = vst [vmem:[#allocation8 + $0x358] sm:$0xff] %v1648_v54 }
 0x195   :  { %1773 = vst [vmem:[#allocation8 + $0x2c0] sm:$0xff] %v1629_v58  ;;  %1789 = vst [vmem:[#allocation8 + $0x340] sm:$0xff] %v1645_v55  ;;  %v677_v60 = vpop.f32.mrb[60].mxu0  ;;  %v1999_v62 = vpop.f32.mrb[60].mxu1 }
 0x196   :  { %v1631_v1 = vadd.f32 %v2360_v63, %v677_v60  ;;  %v1654_v2 = vadd.f32 %v1999_v62, %v2413_v36  ;;  %v679_v3 = vpop.f32.mrb[61].mxu0  ;;  %v1030_v4 = vpop.f32.mrb[61].mxu1 }
 0x197   :  { %v1632_v5 = vadd.f32 %v2363_v0, %v679_v3  ;;  %v1651_v6 = vadd.f32 %v2413_v36, %v1030_v4 }
 0x198   :  { %1775 = vst [vmem:[#allocation8 + $0x2d0] sm:$0xff] %v1631_v1  ;;  %1798 = vst [vmem:[#allocation8 + $0x388] sm:$0xff] %v1654_v2 }
 0x199   :  { %1776 = vst [vmem:[#allocation8 + $0x2d8] sm:$0xff] %v1632_v5  ;;  %1795 = vst [vmem:[#allocation8 + $0x370] sm:$0xff] %v1651_v6  ;;  %v683_v7 = vpop.f32.mrb[62].mxu0  ;;  %v2002_v8 = vpop.f32.mrb[62].mxu1 }
 0x19a   :  { %v1634_v9 = vadd.f32 %v2360_v63, %v683_v7  ;;  %v1660_v10 = vadd.f32 %v2002_v8, %v2413_v36  ;;  %v685_v11 = vpop.f32.mrb[63].mxu0  ;;  %v1040_v12 = vpop.f32.mrb[63].mxu1 }
 0x19b   :  { %v1635_v13 = vadd.f32 %v2363_v0, %v685_v11  ;;  %v1657_v14 = vadd.f32 %v2413_v36, %v1040_v12 }
 0x19c   :  { %1778 = vst [vmem:[#allocation8 + $0x2e8] sm:$0xff] %v1634_v9  ;;  %1804 = vst [vmem:[#allocation8 + $0x3b8] sm:$0xff] %v1660_v10 }
 0x19d   :  { %1779 = vst [vmem:[#allocation8 + $0x2f0] sm:$0xff] %v1635_v13  ;;  %1801 = vst [vmem:[#allocation8 + $0x3a0] sm:$0xff] %v1657_v14  ;;  %v689_v15 = vpop.f32.mrb[64].mxu0  ;;  %v2005_v16 = vpop.f32.mrb[64].mxu1 }
 0x19e   :  { %v1637_v17 = vadd.f32 %v2360_v63, %v689_v15  ;;  %v1666_v18 = vadd.f32 %v2005_v16, %v2413_v36  ;;  %v691_v19 = vpop.f32.mrb[65].mxu0  ;;  %v1050_v20 = vpop.f32.mrb[65].mxu1 }
 0x19f   :  { %v1638_v21 = vadd.f32 %v2363_v0, %v691_v19  ;;  %v1663_v22 = vadd.f32 %v2413_v36, %v1050_v20 }
 0x1a0   :  { %1781 = vst [vmem:[#allocation8 + $0x300] sm:$0xff] %v1637_v17  ;;  %1810 = vst [vmem:[#allocation8 + $0x3e8] sm:$0xff] %v1666_v18 }
 0x1a1   :  { %1782 = vst [vmem:[#allocation8 + $0x308] sm:$0xff] %v1638_v21  ;;  %1807 = vst [vmem:[#allocation8 + $0x3d0] sm:$0xff] %v1663_v22  ;;  %v695_v23 = vpop.f32.mrb[66].mxu0  ;;  %v2008_v24 = vpop.f32.mrb[66].mxu1 }
 0x1a2   :  { %v1640_v25 = vadd.f32 %v2360_v63, %v695_v23  ;;  %v1672_v26 = vadd.f32 %v2008_v24, %v2413_v36  ;;  %v697_v27 = vpop.f32.mrb[67].mxu0  ;;  %v1060_v28 = vpop.f32.mrb[67].mxu1 }
 0x1a3   :  { %v1641_v29 = vadd.f32 %v2363_v0, %v697_v27  ;;  %v1669_v30 = vadd.f32 %v2413_v36, %v1060_v28 }
 0x1a4   :  { %1784 = vst [vmem:[#allocation8 + $0x318] sm:$0xff] %v1640_v25  ;;  %1816 = vst [vmem:[#allocation8 + $0x418] sm:$0xff] %v1672_v26 }
 0x1a5   :  { %1785 = vst [vmem:[#allocation8 + $0x320] sm:$0xff] %v1641_v29  ;;  %1813 = vst [vmem:[#allocation8 + $0x400] sm:$0xff] %v1669_v30  ;;  %v701_v31 = vpop.f32.mrb[68].mxu0  ;;  %v2011_v32 = vpop.f32.mrb[68].mxu1 }
 0x1a6   :  { %v1643_v33 = vadd.f32 %v2360_v63, %v701_v31  ;;  %v1678_v34 = vadd.f32 %v2011_v32, %v2413_v36  ;;  %v703_v35 = vpop.f32.mrb[69].mxu0  ;;  %v1070_v59 = vpop.f32.mrb[69].mxu1 }
 0x1a7   :  { %v1644_v37 = vadd.f32 %v2363_v0, %v703_v35  ;;  %v1675_v38 = vadd.f32 %v2413_v36, %v1070_v59 }
 0x1a8   :  { %1787 = vst [vmem:[#allocation8 + $0x330] sm:$0xff] %v1643_v33  ;;  %1822 = vst [vmem:[#allocation8 + $0x448] sm:$0xff] %v1678_v34 }
 0x1a9   :  { %1788 = vst [vmem:[#allocation8 + $0x338] sm:$0xff] %v1644_v37  ;;  %1819 = vst [vmem:[#allocation8 + $0x430] sm:$0xff] %v1675_v38  ;;  %v707_v39 = vpop.f32.mrb[70].mxu0  ;;  %v2014_v40 = vpop.f32.mrb[70].mxu1 }
 0x1aa   :  { %v1646_v41 = vadd.f32 %v2360_v63, %v707_v39  ;;  %v1684_v42 = vadd.f32 %v2014_v40, %v2413_v36  ;;  %v709_v43 = vpop.f32.mrb[71].mxu0  ;;  %v1080_v44 = vpop.f32.mrb[71].mxu1 }
 0x1ab   :  { %v1647_v61 = vadd.f32 %v2363_v0, %v709_v43  ;;  %v1681_v45 = vadd.f32 %v2413_v36, %v1080_v44 }
 0x1ac   :  { %1790 = vst [vmem:[#allocation8 + $0x348] sm:$0xff] %v1646_v41  ;;  %1828 = vst [vmem:[#allocation8 + $0x478] sm:$0xff] %v1684_v42 }
 0x1ad   :  { %1791 = vst [vmem:[#allocation8 + $0x350] sm:$0xff] %v1647_v61  ;;  %1825 = vst [vmem:[#allocation8 + $0x460] sm:$0xff] %v1681_v45 }
 0x1ae   :  { %2158 = shalt.err (!%p2155_p6)
}
 0x1af   :  { %s2159_s17 = scalar_lea.hbm %s2531_s3, 18432 }
 0x1b0   :  { %p2160_p7 = scmp.ne.s32.totalorder %s2531_s3, %s2159_s17  ;;  %p2163_p8 = scmp.lt.u32.totalorder %s2159_s17, %s2531_s3 }
 0x1b2   :  { %p2165_p9 = pnand %p2163_p8, %p2160_p7 }
 0x1b4   :  { %2168 = shalt.err (!%p2165_p9)
}
 0x1b5   :  { %1840 = dma.vmem_to_hbm [thread:$0]  %s1835_s13, 18432, %s2531_s3, [#allocation5], %s2179_s0, %s2179_s0, %s2180_s9  }
 0x1b6   :  { %2173 = dma.done.wait [#allocation5], 18432  }
 0x1b7   :  { %2174 = vsyncadd [#allocation5], 4294948864 }
 0x1b8   :  { %1844 = vsyncpa [#allocation4], 1 }
 0x1b9   :  { %1845 = vsyncpa [#allocation7], 1 }
 0x1ba   :  { %1846 = vsyncpa [#allocation5], 1 }

</bundles_post_ra>
